<compile_context>
chip_gen: v7x
topology: tpu7x:2x2x1
jax: 0.10.0
libtpu: 0.0.40
codegen_flags: <defaults>
</compile_context>

<pallas_src>
import jax
import jax.numpy as jnp
import numpy as np
from jax.experimental import pallas as pl
from jax.experimental.pallas import tpu as pltpu

WIN_SIZES = (3, 4, 5)                         # self.win_sizes
PADDING = 1                                   # self.padding
CHANNELS = tuple(25 * w for w in WIN_SIZES)   # (75, 100, 125)
C_PAD = 128                                   # conv channels padded to lane-dense width
LABEL_PAD = 128                               # output columns padded for unmasked vst
L_CHUNK = 256                                 # streaming chunk over conv output length


def texcnn_kernel(x_ref,
                  w3_ref, b3_ref,
                  w4_ref, b4_ref,
                  w5_ref, b5_ref,
                  wl_ref, bl_ref,
                  out_ref):
    """Conv1d(k=3,4,5, pad=1) + ReLU + global-max-pool + Linear for one batch tile.

    x_ref  : [Bt, Lp, E]          padded embeddings (bf16), Lp = L + 2*PADDING
    wK_ref : [K*E, C_PAD]         im2col conv weights (bf16), zero-padded channels
    bK_ref : [1, C_PAD]           conv bias (f32), zero-padded
    wl_ref : [3*C_PAD, LABEL_PAD] linear weight (f32), zero rows for padded channels
    bl_ref : [1, LABEL_PAD]       linear bias (f32), zero-padded
    out_ref: [Bt, LABEL_PAD]      f32
    """
    x = x_ref[...]                                   # [Bt, Lp, E] bf16
    Bt, Lp, _E = x.shape
    wl = wl_ref[...]                                 # [3*C_PAD, LABEL_PAD] f32
    out = jnp.broadcast_to(bl_ref[...], (Bt, wl.shape[1])).astype(jnp.float32)

    col = 0
    for w_ref, b_ref, K in ((w3_ref, b3_ref, 3),
                            (w4_ref, b4_ref, 4),
                            (w5_ref, b5_ref, 5)):
        w = w_ref[...]                               # [K*E, C_PAD] bf16
        bias = b_ref[...]                            # [1, C_PAD]   f32
        Lout = Lp - K + 1                            # = L + 2*pad - K + 1
        # Running max over output positions.  Starting at 0 also implements the
        # ReLU:  max_l relu(y_l + b) == max(0, max_l (y_l + b)).
        feat = jnp.zeros((Bt, C_PAD), jnp.float32)
        for start in range(0, Lout, L_CHUNK):        # stream conv output length
            Lc = min(L_CHUNK, Lout - start)
            # im2col: lane-concatenate the K shifted views -> ONE MXU matmul
            # with a K*E-wide contraction instead of K matmuls over E.
            cols = jnp.concatenate(
                [x[:, start + k:start + k + Lc, :] for k in range(K)], axis=-1)
            y = jnp.einsum('blk,kc->blc', cols, w,
                           preferred_element_type=jnp.float32)   # [Bt, Lc, C_PAD]
            feat = jnp.maximum(feat, jnp.max(y, axis=1) + bias)  # ReLU+pool fused
        # torch.cat(feats, dim=1) @ wl == sum of per-branch partial matmuls.
        out = out + jnp.dot(feat, wl[col:col + C_PAD, :],
                            preferred_element_type=jnp.float32)
        col += C_PAD

    out_ref[...] = out


def prepare_params(params):
    """One-time weight re-layout (hoisted out of the forward pass)."""
    E = params['vec_emb'].shape[1]
    label_size = params['wl'].shape[1]
    prepped = {
        'word_emb': params['word_emb'],
        'vec_emb': params['vec_emb'],
        'label_size': label_size,          # python int (kept static)
    }
    wl_blocks = []
    off = 0
    for w in WIN_SIZES:
        C = 25 * w
        # PyTorch Conv1d weight [C, E, K] -> im2col layout [K*E, C_PAD] (bf16)
        wt = jnp.transpose(params[f'conv{w}_w'], (2, 1, 0)).reshape(w * E, C)
        prepped[f'w{w}'] = jnp.pad(wt, ((0, 0), (0, C_PAD - C))).astype(jnp.bfloat16)
        prepped[f'b{w}'] = jnp.pad(params[f'conv{w}_b'],
                                   (0, C_PAD - C))[None, :].astype(jnp.float32)
        # Matching rows of the linear weight; padded channels get zero rows so
        # they contribute nothing, labels padded with zero cols.
        blk = params['wl'][off:off + C]
        wl_blocks.append(jnp.pad(blk, ((0, C_PAD - C), (0, LABEL_PAD - label_size))))
        off += C
    prepped['wl'] = jnp.concatenate(wl_blocks, axis=0).astype(jnp.float32)
    prepped['bl'] = jnp.pad(params['bl'],
                            (0, LABEL_PAD - label_size))[None, :].astype(jnp.float32)
    return prepped


def texcnn_forward(wd_ids, vecwd_ids, prepped, *, batch_tile=8):
    """JAX glue (embedding lookup + pad + batch tiling) around the Pallas kernel."""
    # TODO(synk): fuse the embedding gather + zero padding into the kernel
    # (scalar-prefetch the ids, row-gather via pl.Element / manual DMA) to
    # remove one full HBM write+read of the activation tensor.
    embed = prepped['word_emb'][wd_ids] + prepped['vec_emb'][vecwd_ids]   # [B, L, E]
    B, L, E = embed.shape
    assert L + 2 * PADDING >= max(WIN_SIZES), "sequence too short for the k=5 conv"
    x = jnp.pad(embed, ((0, 0), (PADDING, PADDING), (0, 0))).astype(jnp.bfloat16)
    Lp = L + 2 * PADDING

    # Pad batch up to a multiple of the batch tile; extra rows are sliced off.
    Bt = batch_tile
    Bp = ((B + Bt - 1) // Bt) * Bt
    if Bp != B:
        x = jnp.pad(x, ((0, Bp - B), (0, 0), (0, 0)))

    def full_spec(arr):
        nd = arr.ndim
        return pl.BlockSpec(arr.shape, lambda b, _nd=nd: (0,) * _nd)

    weights = []
    for w in WIN_SIZES:
        weights += [prepped[f'w{w}'], prepped[f'b{w}']]
    weights += [prepped['wl'], prepped['bl']]
    w_specs = [full_spec(a) for a in weights]

    out = pl.pallas_call(
        texcnn_kernel,
        out_shape=jax.ShapeDtypeStruct((Bp, LABEL_PAD), jnp.float32),
        grid_spec=pltpu.PrefetchScalarGridSpec(
            num_scalar_prefetch=0,
            grid=(Bp // Bt,),
            in_specs=[pl.BlockSpec((Bt, Lp, E), lambda b: (b, 0, 0))] + w_specs,
            out_specs=pl.BlockSpec((Bt, LABEL_PAD), lambda b: (b, 0)),
        ),
        compiler_params=pltpu.CompilerParams(
            dimension_semantics=("parallel",),   # megacore sharding on v7x
        ),
    )(x, *weights)
    return out[:B, :prepped['label_size']]


def texcnn_reference(wd_ids, vecwd_ids, params):
    """Pure-JAX f32 reference mirroring the PyTorch forward exactly (eval mode)."""
    embed = params['word_emb'][wd_ids] + params['vec_emb'][vecwd_ids]  # [B, L, E]
    conv_in = jnp.transpose(embed, (0, 2, 1))                          # [B, E, L]
    outs = []
    for w in WIN_SIZES:
        y = jax.lax.conv_general_dilated(
            conv_in, params[f'conv{w}_w'],
            window_strides=(1,), padding=[(PADDING, PADDING)],
            dimension_numbers=('NCH', 'OIH', 'NCH'))
        y = y + params[f'conv{w}_b'][None, :, None]
        y = jnp.maximum(y, 0.0)
        outs.append(jnp.max(y, axis=-1))                               # [B, 25*w]
    feat = jnp.concatenate(outs, axis=1)                               # [B, 300]
    return feat @ params['wl'] + params['bl']


if __name__ == "__main__":
    # Small, forward-consistent shapes.
    B, L, E = 2, 8, 32          # batch, seq len, embedding_dim
    VOCAB, LABELS = 50, 5       # args.vocab_size, args.label_size

    key = jax.random.PRNGKey(0)
    ks = jax.random.split(key, 12)

    params = {
        # nn.Embedding.from_pretrained(embedding_weights) -- frozen, synthetic
        'vec_emb': 0.1 * jax.random.normal(ks[0], (VOCAB, E), jnp.float32),
        # nn.Embedding weight explicitly re-initialized to zeros in __init__
        'word_emb': jnp.zeros((VOCAB, E), jnp.float32),
    }
    ki = 1
    for w in WIN_SIZES:
        C = 25 * w
        params[f'conv{w}_w'] = 0.05 * jax.random.normal(ks[ki], (C, E, w), jnp.float32); ki += 1
        params[f'conv{w}_b'] = 0.05 * jax.random.normal(ks[ki], (C,), jnp.float32); ki += 1
    params['wl'] = 0.05 * jax.random.normal(ks[ki], (sum(CHANNELS), LABELS), jnp.float32); ki += 1
    params['bl'] = 0.05 * jax.random.normal(ks[ki], (LABELS,), jnp.float32); ki += 1

    wd_ids = jax.random.randint(ks[ki], (B, L), 0, VOCAB); ki += 1
    vecwd_ids = jax.random.randint(ks[ki], (B, L), 0, VOCAB)

    prepped = prepare_params(params)
    out = jax.block_until_ready(texcnn_forward(wd_ids, vecwd_ids, prepped))
    ref = jax.block_until_ready(texcnn_reference(wd_ids, vecwd_ids, params))

    assert out.shape == (B, LABELS)
    # bf16 inputs / f32 accumulation -> loosened tolerance vs f32 reference.
    np.testing.assert_allclose(np.asarray(out), np.asarray(ref), rtol=2e-2, atol=5e-3)
    print("KERNEL_OK")
</pallas_src>

<mosaic_0001>
module attributes {stable_mosaic.version = 11 : i64} {
  func.func @texcnn_kernel(%arg0: i32, %arg1: memref<8x10x32xbf16, #tpu.memory_space<vmem>>, %arg2: memref<96x128xbf16, #tpu.memory_space<vmem>>, %arg3: memref<1x128xf32, #tpu.memory_space<vmem>>, %arg4: memref<128x128xbf16, #tpu.memory_space<vmem>>, %arg5: memref<1x128xf32, #tpu.memory_space<vmem>>, %arg6: memref<160x128xbf16, #tpu.memory_space<vmem>>, %arg7: memref<1x128xf32, #tpu.memory_space<vmem>>, %arg8: memref<384x128xf32, #tpu.memory_space<vmem>>, %arg9: memref<1x128xf32, #tpu.memory_space<vmem>>, %arg10: memref<8x128xf32, #tpu.memory_space<vmem>>) attributes {dimension_semantics = [#tpu.dimension_semantics<parallel>], iteration_bounds = array<i64: 1>, scalar_prefetch = 0 : i64, scratch_operands = 0 : i64, tpu.core_type = #tpu.core_type<tc>, window_params = [{transform_indices = @transform_0, window_bounds = array<i64: 8, 10, 32>}, {pipeline_mode = #tpu.pipeline_mode<synchronous>, transform_indices = @transform_1, window_bounds = array<i64: 96, 128>}, {pipeline_mode = #tpu.pipeline_mode<synchronous>, transform_indices = @transform_2, window_bounds = array<i64: 1, 128>}, {pipeline_mode = #tpu.pipeline_mode<synchronous>, transform_indices = @transform_3, window_bounds = array<i64: 128, 128>}, {pipeline_mode = #tpu.pipeline_mode<synchronous>, transform_indices = @transform_4, window_bounds = array<i64: 1, 128>}, {pipeline_mode = #tpu.pipeline_mode<synchronous>, transform_indices = @transform_5, window_bounds = array<i64: 160, 128>}, {pipeline_mode = #tpu.pipeline_mode<synchronous>, transform_indices = @transform_6, window_bounds = array<i64: 1, 128>}, {pipeline_mode = #tpu.pipeline_mode<synchronous>, transform_indices = @transform_7, window_bounds = array<i64: 384, 128>}, {pipeline_mode = #tpu.pipeline_mode<synchronous>, transform_indices = @transform_8, window_bounds = array<i64: 1, 128>}, {transform_indices = @transform_9, window_bounds = array<i64: 8, 128>}]} {
    %c0 = arith.constant 0 : index
    %c0_0 = arith.constant 0 : index
    %c0_1 = arith.constant 0 : index
    %0 = vector.load %arg1[%c0, %c0_0, %c0_1] : memref<8x10x32xbf16, #tpu.memory_space<vmem>>, vector<8x10x32xbf16>
    %c0_2 = arith.constant 0 : index
    %c0_3 = arith.constant 0 : index
    %1 = vector.load %arg8[%c0_2, %c0_3] : memref<384x128xf32, #tpu.memory_space<vmem>>, vector<384x128xf32>
    %c0_4 = arith.constant 0 : index
    %c0_5 = arith.constant 0 : index
    %2 = vector.load %arg9[%c0_4, %c0_5] : memref<1x128xf32, #tpu.memory_space<vmem>>, vector<1x128xf32>
    %3 = vector.shape_cast %2 : vector<1x128xf32> to vector<1x128xf32>
    %4 = vector.broadcast %3 : vector<1x128xf32> to vector<8x128xf32>
    %c0_6 = arith.constant 0 : index
    %c0_7 = arith.constant 0 : index
    %5 = vector.load %arg2[%c0_6, %c0_7] : memref<96x128xbf16, #tpu.memory_space<vmem>>, vector<96x128xbf16>
    %c0_8 = arith.constant 0 : index
    %c0_9 = arith.constant 0 : index
    %6 = vector.load %arg3[%c0_8, %c0_9] : memref<1x128xf32, #tpu.memory_space<vmem>>, vector<1x128xf32>
    %cst = arith.constant 0.000000e+00 : f32
    %7 = vector.broadcast %cst : f32 to vector<8x128xf32>
    %8 = vector.extract_strided_slice %0 {offsets = [0, 0, 0], sizes = [8, 8, 32], strides = [1, 1, 1]} : vector<8x10x32xbf16> to vector<8x8x32xbf16>
    %9 = vector.extract_strided_slice %0 {offsets = [0, 1, 0], sizes = [8, 8, 32], strides = [1, 1, 1]} : vector<8x10x32xbf16> to vector<8x8x32xbf16>
    %10 = vector.extract_strided_slice %0 {offsets = [0, 2, 0], sizes = [8, 8, 32], strides = [1, 1, 1]} : vector<8x10x32xbf16> to vector<8x8x32xbf16>
    %11 = tpu.concatenate %8, %9, %10 in 2 : vector<8x8x32xbf16>, vector<8x8x32xbf16>, vector<8x8x32xbf16> -> vector<8x8x96xbf16>
    "tpu.trace_start"() <{level = 10 : i32, message = "blk,kc->blc"}> : () -> ()
    %cst_10 = arith.constant dense<0.000000e+00> : vector<8x8x128xf32>
    %12 = tpu.matmul %11, %5, %cst_10 {dimension_numbers = #tpu.dot_dimension_numbers<[2], [0], [0, 1], [1], [0, 0, 0, 1, 1, 1], [], []>} : vector<8x8x96xbf16>, vector<96x128xbf16>, vector<8x8x128xf32> -> vector<8x8x128xf32>
    "tpu.trace_stop"() : () -> ()
    %cst_11 = arith.constant dense<0xFF800000> : vector<8x128xf32>
    %13 = vector.multi_reduction <maximumf>, %12, %cst_11 [1] : vector<8x8x128xf32> to vector<8x128xf32>
    %14 = vector.broadcast %6 : vector<1x128xf32> to vector<8x128xf32>
    %15 = arith.addf %13, %14 : vector<8x128xf32>
    %16 = arith.maximumf %7, %15 : vector<8x128xf32>
    %17 = vector.extract_strided_slice %1 {offsets = [0, 0], sizes = [128, 128], strides = [1, 1]} : vector<384x128xf32> to vector<128x128xf32>
    %cst_12 = arith.constant dense<0.000000e+00> : vector<8x128xf32>
    %18 = tpu.matmul %16, %17, %cst_12 {dimension_numbers = #tpu.dot_dimension_numbers<[1], [0], [0], [1], [0, 0, 1, 1], [], []>} : vector<8x128xf32>, vector<128x128xf32>, vector<8x128xf32> -> vector<8x128xf32>
    %19 = arith.addf %4, %18 : vector<8x128xf32>
    %c0_13 = arith.constant 0 : index
    %c0_14 = arith.constant 0 : index
    %20 = vector.load %arg4[%c0_13, %c0_14] : memref<128x128xbf16, #tpu.memory_space<vmem>>, vector<128x128xbf16>
    %c0_15 = arith.constant 0 : index
    %c0_16 = arith.constant 0 : index
    %21 = vector.load %arg5[%c0_15, %c0_16] : memref<1x128xf32, #tpu.memory_space<vmem>>, vector<1x128xf32>
    %cst_17 = arith.constant 0.000000e+00 : f32
    %22 = vector.broadcast %cst_17 : f32 to vector<8x128xf32>
    %23 = vector.extract_strided_slice %0 {offsets = [0, 0, 0], sizes = [8, 7, 32], strides = [1, 1, 1]} : vector<8x10x32xbf16> to vector<8x7x32xbf16>
    %24 = vector.extract_strided_slice %0 {offsets = [0, 1, 0], sizes = [8, 7, 32], strides = [1, 1, 1]} : vector<8x10x32xbf16> to vector<8x7x32xbf16>
    %25 = vector.extract_strided_slice %0 {offsets = [0, 2, 0], sizes = [8, 7, 32], strides = [1, 1, 1]} : vector<8x10x32xbf16> to vector<8x7x32xbf16>
    %26 = vector.extract_strided_slice %0 {offsets = [0, 3, 0], sizes = [8, 7, 32], strides = [1, 1, 1]} : vector<8x10x32xbf16> to vector<8x7x32xbf16>
    %27 = tpu.concatenate %23, %24, %25, %26 in 2 : vector<8x7x32xbf16>, vector<8x7x32xbf16>, vector<8x7x32xbf16>, vector<8x7x32xbf16> -> vector<8x7x128xbf16>
    "tpu.trace_start"() <{level = 10 : i32, message = "blk,kc->blc"}> : () -> ()
    %cst_18 = arith.constant dense<0.000000e+00> : vector<8x7x128xf32>
    %28 = tpu.matmul %27, %20, %cst_18 {dimension_numbers = #tpu.dot_dimension_numbers<[2], [0], [0, 1], [1], [0, 0, 0, 1, 1, 1], [], []>} : vector<8x7x128xbf16>, vector<128x128xbf16>, vector<8x7x128xf32> -> vector<8x7x128xf32>
    "tpu.trace_stop"() : () -> ()
    %cst_19 = arith.constant dense<0xFF800000> : vector<8x128xf32>
    %29 = vector.multi_reduction <maximumf>, %28, %cst_19 [1] : vector<8x7x128xf32> to vector<8x128xf32>
    %30 = vector.broadcast %21 : vector<1x128xf32> to vector<8x128xf32>
    %31 = arith.addf %29, %30 : vector<8x128xf32>
    %32 = arith.maximumf %22, %31 : vector<8x128xf32>
    %33 = vector.extract_strided_slice %1 {offsets = [128, 0], sizes = [128, 128], strides = [1, 1]} : vector<384x128xf32> to vector<128x128xf32>
    %cst_20 = arith.constant dense<0.000000e+00> : vector<8x128xf32>
    %34 = tpu.matmul %32, %33, %cst_20 {dimension_numbers = #tpu.dot_dimension_numbers<[1], [0], [0], [1], [0, 0, 1, 1], [], []>} : vector<8x128xf32>, vector<128x128xf32>, vector<8x128xf32> -> vector<8x128xf32>
    %35 = arith.addf %19, %34 : vector<8x128xf32>
    %c0_21 = arith.constant 0 : index
    %c0_22 = arith.constant 0 : index
    %36 = vector.load %arg6[%c0_21, %c0_22] : memref<160x128xbf16, #tpu.memory_space<vmem>>, vector<160x128xbf16>
    %c0_23 = arith.constant 0 : index
    %c0_24 = arith.constant 0 : index
    %37 = vector.load %arg7[%c0_23, %c0_24] : memref<1x128xf32, #tpu.memory_space<vmem>>, vector<1x128xf32>
    %cst_25 = arith.constant 0.000000e+00 : f32
    %38 = vector.broadcast %cst_25 : f32 to vector<8x128xf32>
    %39 = vector.extract_strided_slice %0 {offsets = [0, 0, 0], sizes = [8, 6, 32], strides = [1, 1, 1]} : vector<8x10x32xbf16> to vector<8x6x32xbf16>
    %40 = vector.extract_strided_slice %0 {offsets = [0, 1, 0], sizes = [8, 6, 32], strides = [1, 1, 1]} : vector<8x10x32xbf16> to vector<8x6x32xbf16>
    %41 = vector.extract_strided_slice %0 {offsets = [0, 2, 0], sizes = [8, 6, 32], strides = [1, 1, 1]} : vector<8x10x32xbf16> to vector<8x6x32xbf16>
    %42 = vector.extract_strided_slice %0 {offsets = [0, 3, 0], sizes = [8, 6, 32], strides = [1, 1, 1]} : vector<8x10x32xbf16> to vector<8x6x32xbf16>
    %43 = vector.extract_strided_slice %0 {offsets = [0, 4, 0], sizes = [8, 6, 32], strides = [1, 1, 1]} : vector<8x10x32xbf16> to vector<8x6x32xbf16>
    %44 = tpu.concatenate %39, %40, %41, %42, %43 in 2 : vector<8x6x32xbf16>, vector<8x6x32xbf16>, vector<8x6x32xbf16>, vector<8x6x32xbf16>, vector<8x6x32xbf16> -> vector<8x6x160xbf16>
    "tpu.trace_start"() <{level = 10 : i32, message = "blk,kc->blc"}> : () -> ()
    %cst_26 = arith.constant dense<0.000000e+00> : vector<8x6x128xf32>
    %45 = tpu.matmul %44, %36, %cst_26 {dimension_numbers = #tpu.dot_dimension_numbers<[2], [0], [0, 1], [1], [0, 0, 0, 1, 1, 1], [], []>} : vector<8x6x160xbf16>, vector<160x128xbf16>, vector<8x6x128xf32> -> vector<8x6x128xf32>
    "tpu.trace_stop"() : () -> ()
    %cst_27 = arith.constant dense<0xFF800000> : vector<8x128xf32>
    %46 = vector.multi_reduction <maximumf>, %45, %cst_27 [1] : vector<8x6x128xf32> to vector<8x128xf32>
    %47 = vector.broadcast %37 : vector<1x128xf32> to vector<8x128xf32>
    %48 = arith.addf %46, %47 : vector<8x128xf32>
    %49 = arith.maximumf %38, %48 : vector<8x128xf32>
    %50 = vector.extract_strided_slice %1 {offsets = [256, 0], sizes = [128, 128], strides = [1, 1]} : vector<384x128xf32> to vector<128x128xf32>
    %cst_28 = arith.constant dense<0.000000e+00> : vector<8x128xf32>
    %51 = tpu.matmul %49, %50, %cst_28 {dimension_numbers = #tpu.dot_dimension_numbers<[1], [0], [0], [1], [0, 0, 1, 1], [], []>} : vector<8x128xf32>, vector<128x128xf32>, vector<8x128xf32> -> vector<8x128xf32>
    %52 = arith.addf %35, %51 : vector<8x128xf32>
    %c0_29 = arith.constant 0 : index
    %c0_30 = arith.constant 0 : index
    %53 = vector.load %arg10[%c0_29, %c0_30] : memref<8x128xf32, #tpu.memory_space<vmem>>, vector<8x128xf32>
    tpu.vector_store %arg10[%c0_29, %c0_30], %52 {strides = array<i32>} : memref<8x128xf32, #tpu.memory_space<vmem>>, vector<8x128xf32>,
    return
  }
  func.func @transform_0(%arg0: i32) -> (i32, i32, i32) {
    %c0_i32 = arith.constant 0 : i32
    %c0_i32_0 = arith.constant 0 : i32
    %c0_i32_1 = arith.constant 0 : i32
    return %arg0, %c0_i32, %c0_i32_0 : i32, i32, i32
  }
  func.func @transform_1(%arg0: i32) -> (i32, i32) {
    %c0_i32 = arith.constant 0 : i32
    %c0_i32_0 = arith.constant 0 : i32
    %c0_i32_1 = arith.constant 0 : i32
    return %c0_i32, %c0_i32_0 : i32, i32
  }
  func.func @transform_2(%arg0: i32) -> (i32, i32) {
    %c0_i32 = arith.constant 0 : i32
    %c0_i32_0 = arith.constant 0 : i32
    %c0_i32_1 = arith.constant 0 : i32
    return %c0_i32, %c0_i32_0 : i32, i32
  }
  func.func @transform_3(%arg0: i32) -> (i32, i32) {
    %c0_i32 = arith.constant 0 : i32
    %c0_i32_0 = arith.constant 0 : i32
    %c0_i32_1 = arith.constant 0 : i32
    return %c0_i32, %c0_i32_0 : i32, i32
  }
  func.func @transform_4(%arg0: i32) -> (i32, i32) {
    %c0_i32 = arith.constant 0 : i32
    %c0_i32_0 = arith.constant 0 : i32
    %c0_i32_1 = arith.constant 0 : i32
    return %c0_i32, %c0_i32_0 : i32, i32
  }
  func.func @transform_5(%arg0: i32) -> (i32, i32) {
    %c0_i32 = arith.constant 0 : i32
    %c0_i32_0 = arith.constant 0 : i32
    %c0_i32_1 = arith.constant 0 : i32
    return %c0_i32, %c0_i32_0 : i32, i32
  }
  func.func @transform_6(%arg0: i32) -> (i32, i32) {
    %c0_i32 = arith.constant 0 : i32
    %c0_i32_0 = arith.constant 0 : i32
    %c0_i32_1 = arith.constant 0 : i32
    return %c0_i32, %c0_i32_0 : i32, i32
  }
  func.func @transform_7(%arg0: i32) -> (i32, i32) {
    %c0_i32 = arith.constant 0 : i32
    %c0_i32_0 = arith.constant 0 : i32
    %c0_i32_1 = arith.constant 0 : i32
    return %c0_i32, %c0_i32_0 : i32, i32
  }
  func.func @transform_8(%arg0: i32) -> (i32, i32) {
    %c0_i32 = arith.constant 0 : i32
    %c0_i32_0 = arith.constant 0 : i32
    %c0_i32_1 = arith.constant 0 : i32
    return %c0_i32, %c0_i32_0 : i32, i32
  }
  func.func @transform_9(%arg0: i32) -> (i32, i32) {
    %c0_i32 = arith.constant 0 : i32
    %c0_i32_0 = arith.constant 0 : i32
    return %arg0, %c0_i32 : i32, i32
  }
}

</mosaic_0001>

<bundles_post_ra>
// kernel: tpu_custom_call.1
= control target key start
LH: loop header
LB: loop body
LE: loop exit
PB: predicated region body
PF: predicated region fallthrough
CT: control target
= control target key end

     0   :  { %14 = vsyncpa [#allocation3], 0  ;;  %s4994_s0 = inlined_call_operand.vmem [shape: bf16[8,10,32], index: 0, kind: input, shape index: {}]   ;;  %s4995_s1 = inlined_call_operand.hbm [shape: bf16[96,128], index: 1, kind: input, shape index: {}]   ;;  %s4996_s2 = inlined_call_operand.vmem [shape: f32[1,128], index: 2, kind: input, shape index: {}]   ;;  %s4997_s3 = inlined_call_operand.hbm [shape: bf16[128,128], index: 3, kind: input, shape index: {}]   ;;  %s4998_s4 = inlined_call_operand.vmem [shape: f32[1,128], index: 4, kind: input, shape index: {}]   ;;  %s4999_s5 = inlined_call_operand.vmem [shape: bf16[160,128], index: 5, kind: input, shape index: {}]   ;;  %s5000_s6 = inlined_call_operand.vmem [shape: f32[1,128], index: 6, kind: input, shape index: {}]   ;;  %s5001_s7 = inlined_call_operand.hbm [shape: f32[384,128], index: 7, kind: input, shape index: {}]   ;;  %s5002_s8 = inlined_call_operand.vmem [shape: f32[1,128], index: 8, kind: input, shape index: {}]   ;;  %s5003_s9 = inlined_call_operand.hbm [shape: f32[8,128], index: 9, kind: output, shape index: {}]  }
   0x1   :  { %15 = vsyncpa [#allocation6], 0 }
   0x2   :  { %16 = vsyncpa [#allocation4], 0  ;;  %s3869_s30 = smov [#allocation5]   ;;  %s3870_s11 = smov [#allocation2]  }
   0x3   :  { %s38_s10 = sshll.u32 %s3869_s30, 4  ;;  %s24_s12 = sshll.u32 %s3870_s11, 4  ;;  %s39_s10 = int_to_ptr.vmem [resolvable:$true] %s38_s10  ;;  %s3935_s12 = int_to_ptr.vmem [resolvable:$true] %s24_s12 }
   0x4   :  { %s3775_s15 = scalar_lea.hbm %s4997_s3, 1024 }
   0x5   :  { %p3776_p0 = scmp.ne.s32.totalorder %s4997_s3, %s3775_s15  ;;  %p3779_p1 = scmp.lt.u32.totalorder %s3775_s15, %s4997_s3 }
   0x7   :  { %p3781_p2 = pnand %p3779_p1, %p3776_p0 }
   0x9   :  { %3784 = shalt.err (!%p3781_p2)
}
   0xa   :  { %s3785_s20 = scalar_lea.vmem %s39_s10, 1024  ;;  %p3790_p4 = scmp.lt.s32.totalorder %s39_s10, %s39_s10 }
   0xb   :  { %p3786_p3 = scmp.ne.s32.totalorder %s39_s10, %s3785_s20  ;;  %p3791_p5 = scmp.lt.s32.totalorder %s3785_s20, %s3785_s20 }
   0xd   :  { %p3792_p6 = por %p3791_p5, %p3790_p4 }
   0xf   :  { %p3793_p7 = pnand %p3792_p6, %p3786_p3 }
  0x11   :  { %3796 = shalt.err (!%p3793_p7)
}
  0x12   :  { %s3871_s21 = smov 64   ;;  %s3872_s22 = smov 4  }
  0x13   :  { %44 = dma.hbm_to_vmem [thread:$0]  %s4997_s3, 1024, %s39_s10, [#allocation6], %s3871_s21, %s3871_s21, %s3872_s22  }
  0x14   :  { %s3797_s27 = scalar_lea.hbm %s4995_s1, 768 }
  0x15   :  { %p3798_p8 = scmp.ne.s32.totalorder %s4995_s1, %s3797_s27  ;;  %p3801_p9 = scmp.lt.u32.totalorder %s3797_s27, %s4995_s1 }
  0x17   :  { %p3803_p10 = pnand %p3801_p9, %p3798_p8 }
  0x19   :  { %3806 = shalt.err (!%p3803_p10)
}
  0x1a   :  { %s3807_s13 = scalar_lea.vmem %s3935_s12, 768  ;;  %p3812_p12 = scmp.lt.s32.totalorder %s3935_s12, %s3935_s12 }
  0x1b   :  { %p3808_p11 = scmp.ne.s32.totalorder %s3935_s12, %s3807_s13  ;;  %p3813_p13 = scmp.lt.s32.totalorder %s3807_s13, %s3807_s13 }
  0x1d   :  { %p3814_p0 = por %p3813_p13, %p3812_p12 }
  0x1f   :  { %p3815_p1 = pnand %p3814_p0, %p3808_p11 }
  0x21   :  { %3818 = shalt.err (!%p3815_p1)
}
  0x22   :  { %30 = dma.hbm_to_vmem [thread:$0]  %s4995_s1, 768, %s3935_s12, [#allocation3], %s3871_s21, %s3871_s21, %s3872_s22  }
  0x23   :  { %s3873_s14 = smov [#allocation7]   ;;  %s3819_s18 = scalar_lea.hbm %s5001_s7, 6144 }
  0x24   :  { %s56_s15 = sshll.u32 %s3873_s14, 4  ;;  %p3820_p2 = scmp.ne.s32.totalorder %s5001_s7, %s3819_s18  ;;  %s57_s15 = int_to_ptr.vmem [resolvable:$true] %s56_s15 }
  0x25   :  { %p3823_p3 = scmp.lt.u32.totalorder %s3819_s18, %s5001_s7 }
  0x27   :  { %p3825_p4 = pnand %p3823_p3, %p3820_p2 }
  0x29   :  { %3828 = shalt.err (!%p3825_p4)
}
  0x2a   :  { %s3829_s25 = scalar_lea.vmem %s57_s15, 6144  ;;  %p3834_p6 = scmp.lt.s32.totalorder %s57_s15, %s57_s15 }
  0x2b   :  { %p3830_p5 = scmp.ne.s32.totalorder %s57_s15, %s3829_s25  ;;  %p3835_p7 = scmp.lt.s32.totalorder %s3829_s25, %s3829_s25 }
  0x2d   :  { %p3836_p8 = por %p3835_p7, %p3834_p6 }
  0x2f   :  { %p3837_p9 = pnand %p3836_p8, %p3830_p5 }
  0x31   :  { %3840 = shalt.err (!%p3837_p9)
}
  0x32   :  { %s3874_s1 = smov 128   ;;  %s3875_s12 = smov 8  }
  0x33   :  { %62 = dma.hbm_to_vmem [thread:$0]  %s5001_s7, 6144, %s57_s15, [#allocation6], %s3874_s1, %s3874_s1, %s3875_s12  }
  0x34   :  { %3863 = dma.done.wait [#allocation3], 768  }
  0x35   :  { %3864 = vsyncadd [#allocation3], 4294966528 }
  0x36   :  { %3865 = dma.done.wait [#allocation6], 7168  }
  0x37   :  { %3866 = vsyncadd [#allocation6], 4294960128  ;;  %v3985_v0 = vld [vmem:[%s4994_s0 + $0x8] sm:$0xf]  ;;  %v78_v1 = vld [vmem:[%s4994_s0 + $0xc] sm:$0x1] }
  0x38   :  { %v3993_v2 = vld [vmem:[%s4994_s0] sm:$0xf]  ;;  %v3996_v3 = vcombine.low %v3985_v0, %v78_v1  ;;  %v76_v4 = vld [vmem:[%s4994_s0 + $0x4] sm:$0x1]  ;;  %v4004_v5 = vld [vmem:[%s4994_s0 + $0x18] sm:$0xf]  ;;  %v4031_v16 = vcombine.low %v3985_v0, %v3985_v0 }
  0x39   :  { %v82_v6 = vld [vmem:[%s4994_s0 + $0x1c] sm:$0x1]  ;;  %v4010_v7 = vcombine.low %v3993_v2, %v76_v4  ;;  %v4018_v9 = vld [vmem:[%s4994_s0 + $0x10] sm:$0xf]  ;;  %v80_v10 = vld [vmem:[%s4994_s0 + $0x14] sm:$0x1]  ;;  %v4035_v17 = vcombine.low %v3993_v2, %v3993_v2  ;;  %v4053_v28 = vcombine.low %v4004_v5, %v4004_v5 }
  0x3a   :  { %v4013_v8 = vcombine.low %v4004_v5, %v82_v6  ;;  %v272_v11 = vrot.slane %v3996_v3, 1  ;;  %v4025_v12 = vcombine.low %v4018_v9, %v80_v10  ;;  %v3751_v13 = vld [vmem:[#allocation2] sm:$0xff]   ;;  %v209_v21 = vshll.u32 %v3996_v3, 16  ;;  %v3752_v33 = vld [vmem:[#allocation2 + $0x8] sm:$0xff]   ;;  %v3753_v39 = vld [vmem:[#allocation2 + $0x10] sm:$0xff]   ;;  %s3876_s23 = smov 32  }
  0x3b   :  { %v271_v14 = vrot.slane %v4010_v7, 1  ;;  %v202_v15 = vshll.u32 %v4010_v7, 16  ;;  %3493 = vmatprep.subr.bf16.mxu0 %v3751_v13  ;;  %v200_v23 = vshrl.u32 %v4010_v7, 16  ;;  %v207_v27 = vshrl.u32 %v3996_v3, 16  ;;  %v3754_v44 = vld [vmem:[#allocation2 + $0x18] sm:$0xff]   ;;  %v3755_v51 = vld [vmem:[#allocation2 + $0x20] sm:$0xff]  }
  0x3c   :  { %281 = vrot.lane.b32.xlu1 %v272_v11, %s3871_s21  ;;  %v274_v18 = vrot.slane %v4013_v8, 1  ;;  %v214_v19 = vshrl.u32 %v4025_v12, 16  ;;  %v216_v20 = vshll.u32 %v4025_v12, 16  ;;  %v273_v22 = vrot.slane %v4025_v12, 1  ;;  %3494 = vmatpush3.bf16.msra.mxu0 %v3751_v13  ;;  %v4081_v55 = vld [vmem:[%s4994_s0 + $0x20] sm:$0xf] }
  0x3d   :  { %279 = vrot.lane.b32.xlu0 %v271_v14, %s3871_s21  ;;  %v204_v24 = vrot.slane %v202_v15, 1  ;;  %v223_v25 = vshll.u32 %v4013_v8, 16  ;;  %v221_v30 = vshrl.u32 %v4013_v8, 16  ;;  %v677_v32 = vshll.u32 %v4031_v16, 16  ;;  %3495 = vmatprep.subr.bf16.mxu0 %v3752_v33  ;;  %v84_v57 = vld [vmem:[%s4994_s0 + $0x24] sm:$0x1] }
  0x3e   :  { %v218_v26 = vrot.slane %v216_v20, 1  ;;  %v211_v35 = vrot.slane %v209_v21, 1  ;;  %v670_v36 = vshll.u32 %v4035_v17, 16  ;;  %v4066_v37 = vcombine.low %v4018_v9, %v4018_v9  ;;  %v4090_v60 = vld [vmem:[%s4994_s0 + $0x30] sm:$0xf]  ;;  %v3756_v61 = vld [vmem:[#allocation2 + $0x28] sm:$0xff]  }
  0x3f   :  { %v225_v31 = vrot.slane %v223_v25, 1  ;;  %v205_v34 = vor.u32 %v204_v24, %v200_v23  ;;  %v675_v38 = vshrl.u32 %v4031_v16, 16  ;;  %v679_v41 = vrot.slane %v677_v32, 1  ;;  %v88_v10 = vld [vmem:[%s4994_s0 + $0x34] sm:$0x1]  ;;  %s3877_s10 = smov 96  }
  0x40   :  { %285 = vrot.lane.b32.xlu1 %v274_v18, %s3871_s21  ;;  %v219_v29 = vor.u32 %v218_v26, %v214_v19  ;;  %3496 = vmatpush3.bf16.msra.mxu0 %v3752_v33  ;;  %v668_v42 = vshrl.u32 %v4035_v17, 16  ;;  %v691_v43 = vshll.u32 %v4053_v28, 16  ;;  %v212_v45 = vor.u32 %v211_v35, %v207_v27  ;;  %v4108_v11 = vld [vmem:[%s4994_s0 + $0x28] sm:$0xf]  ;;  %v90_v32 = vld [vmem:[%s4994_s0 + $0x3c] sm:$0x1] }
  0x41   :  { %283 = vrot.lane.b32.xlu0 %v273_v22, %s3871_s21  ;;  %v226_v40 = vor.u32 %v225_v31, %v221_v30  ;;  %v672_v46 = vrot.slane %v670_v36, 1  ;;  %v684_v47 = vshll.u32 %v4066_v37, 16  ;;  %3497 = vmatprep.subr.bf16.mxu0 %v3753_v39  ;;  %v680_v48 = vor.u32 %v679_v41, %v675_v38  ;;  %s3884_s15 = smov [#allocation8]  }
  0x42   :  { %v689_v49 = vshrl.u32 %v4053_v28, 16  ;;  %v693_v50 = vrot.slane %v691_v43, 1  ;;  %v682_v53 = vshrl.u32 %v4066_v37, 16  ;;  %v742_v56 = vrot.slane %v207_v27, 1  ;;  %v4131_v27 = vld [vmem:[%s4994_s0 + $0x38] sm:$0xf] }
  0x43   :  { %v673_v52 = vor.u32 %v672_v46, %v668_v42  ;;  %v686_v54 = vrot.slane %v684_v47, 1  ;;  %v743_v59 = vrot.slane %v209_v21, 2  ;;  %v739_v63 = vrot.slane %v200_v23, 1  ;;  %v4115_v21 = vld [vmem:[#allocation5] sm:$0xff]  }
  0x44   :  { %259 = vrot.lane.b32.xlu1 %v219_v29, %s3876_s23  ;;  %3498 = vmatpush3.bf16.msra.mxu0 %v3753_v39  ;;  %v694_v58 = vor.u32 %v693_v50, %v689_v49  ;;  %v740_v1 = vrot.slane %v202_v15, 2  ;;  %v4097_v4 = vcombine.low %v4081_v55, %v4081_v55  ;;  %v4100_v6 = vcombine.low %v4081_v55, %v84_v57 }
  0x45   :  { %255 = vrot.lane.b32.xlu0 %v205_v34, %s3876_s23  ;;  %3499 = vmatprep.subr.bf16.mxu0 %v3754_v44  ;;  %v687_v62 = vor.u32 %v686_v54, %v682_v53  ;;  %v744_v13 = vor.u32 %v743_v59, %v742_v56  ;;  %v748_v14 = vrot.slane %v221_v30, 1  ;;  %v749_v15 = vrot.slane %v223_v25, 2  ;;  %v86_v25 = vld [vmem:[%s4994_s0 + $0x2c] sm:$0x1]  ;;  %s3333_s0 = sshll.u32 %s3884_s15, 4  ;;  %s3334_s0 = int_to_ptr.vmem [resolvable:$true] %s3333_s0 }
  0x46   :  { %v745_v18 = vrot.slane %v214_v19, 1  ;;  %v741_v22 = vor.u32 %v740_v1, %v739_v63  ;;  %v746_v23 = vrot.slane %v216_v20, 2  ;;  %v698_v24 = vshll.u32 %v4097_v4, 16  ;;  %p3846_p11 = scmp.lt.s32.totalorder %s3334_s0, %s3334_s0 }
  0x47   :  { %v4122_v26 = vcombine.low %v4090_v60, %v88_v10  ;;  %v228_v19 = vshrl.u32 %v4100_v6, 16  ;;  %v750_v20 = vor.u32 %v749_v15, %v748_v14  ;;  %v696_v29 = vshrl.u32 %v4097_v4, 16 }
  0x48   :  { %261 = vrot.lane.b32.xlu1 %v226_v40, %s3876_s23  ;;  %3500 = vmatpush3.bf16.msra.mxu0 %v3754_v44  ;;  %v230_v30 = vshll.u32 %v4100_v6, 16  ;;  %v4137_v31 = vcombine.low %v4108_v11, %v86_v25  ;;  %v747_v33 = vor.u32 %v746_v23, %v745_v18  ;;  %v700_v34 = vrot.slane %v698_v24, 1 }
  0x49   :  { %257 = vrot.lane.b32.xlu0 %v212_v45, %s3876_s23  ;;  %3501 = vmatprep.subr.bf16.mxu0 %v3755_v51  ;;  %v244_v35 = vshll.u32 %v4122_v26, 16  ;;  %v275_v36 = vrot.slane %v4100_v6, 1  ;;  %v751_v38 = vrot.slane %v228_v19, 1  ;;  %v242_v39 = vshrl.u32 %v4122_v26, 16 }
  0x4a   :  { %v235_v40 = vshrl.u32 %v4137_v31, 16  ;;  %v232_v41 = vrot.slane %v230_v30, 1  ;;  %v237_v42 = vshll.u32 %v4137_v31, 16  ;;  %v4151_v43 = vcombine.low %v4131_v27, %v90_v32 }
  0x4b   :  { %v701_v44 = vor.u32 %v700_v34, %v696_v29  ;;  %v752_v45 = vrot.slane %v230_v30, 2  ;;  %v246_v46 = vrot.slane %v244_v35, 1  ;;  %v3372_v56 = vcombine.low %v4108_v11, %v4108_v11 }
  0x4c   :  { %725 = vrot.lane.b32.xlu1 %v680_v48, %s3876_s23  ;;  %3502 = vmatpush3.bf16.msra.mxu0 %v3755_v51  ;;  %v233_v47 = vor.u32 %v232_v41, %v228_v19  ;;  %v239_v48 = vrot.slane %v237_v42, 1  ;;  %v251_v49 = vshll.u32 %v4151_v43, 16  ;;  %v249_v53 = vshrl.u32 %v4151_v43, 16 }
  0x4d   :  { %723 = vrot.lane.b32.xlu0 %v673_v52, %s3876_s23  ;;  %3503 = vmatprep.subr.bf16.mxu0 %v3756_v61  ;;  %v753_v50 = vor.u32 %v752_v45, %v751_v38  ;;  %v247_v51 = vor.u32 %v246_v46, %v242_v39  ;;  %v276_v57 = vrot.slane %v4137_v31, 1  ;;  %v278_v63 = vrot.slane %v4151_v43, 1 }
  0x4e   :  { %v240_v52 = vor.u32 %v239_v48, %v235_v40  ;;  %v253_v54 = vrot.slane %v251_v49, 1  ;;  %v754_v1 = vrot.slane %v235_v40, 1  ;;  %v755_v10 = vrot.slane %v237_v42, 2 }
  0x4f   :  { %v277_v14 = vrot.slane %v4122_v26, 1  ;;  %v703_v15 = vshrl.u32 %v3372_v56, 16  ;;  %v760_v32 = vrot.slane %v249_v53, 1  ;;  %v758_v38 = vrot.slane %v244_v35, 2 }
  0x50   :  { %729 = vrot.lane.b32.xlu1 %v694_v58, %s3876_s23  ;;  %3504 = vmatpush3.bf16.msra.mxu0 %v3756_v61  ;;  %v3374_v58 = vcombine.low %v4131_v27, %v4131_v27  ;;  %v254_v59 = vor.u32 %v253_v54, %v249_v53  ;;  %v705_v61 = vshll.u32 %v3372_v56, 16  ;;  %v756_v23 = vor.u32 %v755_v10, %v754_v1 }
  0x51   :  { %727 = vrot.lane.b32.xlu0 %v687_v62, %s3876_s23  ;;  %3548 = vmatprep.subr.bf16.mxu0 %v4115_v21  ;;  %v3373_v62 = vcombine.low %v4090_v60, %v4090_v60  ;;  %v2327_v42 = vrot.slane %v4031_v16, 1  ;;  %v2329_v45 = vrot.slane %v4053_v28, 1  ;;  %v2328_v35 = vrot.slane %v4066_v37, 1 }
  0x52   :  { %v707_v18 = vrot.slane %v705_v61, 1  ;;  %v717_v24 = vshrl.u32 %v3374_v58, 16  ;;  %v2330_v46 = vrot.slane %v4097_v4, 1  ;;  %v2333_v16 = vrot.slane %v3374_v58, 1 }
  0x53   :  { %vm295_vm0 = vcmask 261120   ;;  %vm320_vm1 = vcmask 523264   ;;  %vm393_vm2 = vcmask 785408   ;;  %vm3881_vm3 = vmmov 0  }
  0x54   :  { %765 = vrot.lane.b32.xlu1 %v744_v13, %s3877_s10  ;;  %v719_v13 = vshll.u32 %v3374_v58, 16  ;;  %v708_v19 = vor.u32 %v707_v18, %v703_v15  ;;  %v3758_v18 = vld [vmem:[#allocation5 + $0x8] sm:$0xff]   ;;  %vm550_vm4 = vcmask 1041409   ;;  %vm553_vm5 = vcmask 1042434  }
  0x55   :  { %763 = vrot.lane.b32.xlu0 %v741_v22, %s3877_s10  ;;  %v712_v22 = vshll.u32 %v3373_v62, 16  ;;  %vm556_vm6 = vcmask 1043459   ;;  %vm2132_vm7 = vcmask 1046528   ;;  %vm559_vm8 = vcmask 1044484  }
  0x56   :  { %v721_v25 = vrot.slane %v719_v13, 1  ;;  %vm562_vm9 = vcmask 1045509   ;;  %vm565_vm10 = vcmask 1046534   ;;  %vm568_vm11 = vcmask 1047559  }
  0x57   :  { %v714_v29 = vrot.slane %v712_v22, 1  ;;  %vm3153_vm12 = vcmask 1045504  }
  0x58   :  { %769 = vrot.lane.b32.xlu1 %v750_v20, %s3877_s10  ;;  %v710_v20 = vshrl.u32 %v3373_v62, 16  ;;  %v722_v30 = vor.u32 %v721_v25, %v717_v24 }
  0x59   :  { %767 = vrot.lane.b32.xlu0 %v747_v33, %s3877_s10  ;;  %v761_v33 = vrot.slane %v251_v49, 2 }
  0x5a   :  { %v715_v34 = vor.u32 %v714_v29, %v710_v20  ;;  %v3759_v20 = vld [vmem:[#allocation5 + $0x10] sm:$0xff]  }
  0x5b   :  { %v762_v40 = vor.u32 %v761_v33, %v760_v32 }
  0x5c   :  { %287 = vrot.lane.b32.xlu1 %v275_v36, %s3871_s21  ;;  %v757_v36 = vrot.slane %v242_v39, 1  ;;  %v2331_v39 = vrot.slane %v3372_v56, 1  ;;  %v3878_v56 = vmov 1966171168  }
  0x5d   :  { %731 = vrot.lane.b32.xlu0 %v701_v44, %s3876_s23  ;;  %v2326_v44 = vrot.slane %v4035_v17, 1  ;;  %v2332_v17 = vrot.slane %v3373_v62, 1  ;;  %v830_v62 = vlaneseq }
  0x5e   :  { %v759_v41 = vor.u32 %v758_v38, %v757_v36  ;;  %v3760_v36 = vld [vmem:[#allocation5 + $0x18] sm:$0xff]  }
  0x60   :  { %263 = vrot.lane.b32.xlu1 %v233_v47, %s3876_s23 }
  0x61   :  { %771 = vrot.lane.b32.xlu0 %v753_v50, %s3877_s10 }
  0x64   :  { %267 = vrot.lane.b32.xlu1 %v247_v51, %s3876_s23 }
  0x65   :  { %265 = vrot.lane.b32.xlu0 %v240_v52, %s3876_s23 }
  0x68   :  { %289 = vrot.lane.b32.xlu1 %v276_v57, %s3871_s21  ;;  %v828_v57 = vunpack.c.l.s4 %v3878_v56 }
  0x69   :  { %269 = vrot.lane.b32.xlu0 %v254_v59, %s3876_s23 }
  0x6a   :  { %v829_v22 = vunpack.c.0.s8 %v828_v57 }
  0x6c   :  { %293 = vrot.lane.b32.xlu1 %v278_v63, %s3871_s21 }
  0x6d   :  { %291 = vrot.lane.b32.xlu0 %v277_v14, %s3871_s21 }
  0x70   :  { %773 = vrot.lane.b32.xlu1 %v756_v23, %s3877_s10  ;;  %v4210_v23 = vshrl.u32 %v830_v62, 7  ;;  %v3762_v62 = vld [vmem:[#allocation5 + $0x28] sm:$0xff]  }
  0x71   :  { %733 = vrot.lane.b32.xlu0 %v708_v19, %s3876_s23 }
  0x74   :  { %737 = vrot.lane.b32.xlu1 %v722_v30, %s3876_s23  ;;  %v4223_v30 = vsub.s32 %v829_v22, %v4210_v23 }
  0x75   :  { %735 = vrot.lane.b32.xlu0 %v715_v34, %s3876_s23 }
  0x78   :  { %777 = vrot.lane.b32.xlu1 %v762_v40, %s3877_s10 }
  0x79   :  { %775 = vrot.lane.b32.xlu0 %v759_v41, %s3877_s10 }
  0x7c   :  { %2336 = vrot.lane.b32.xlu1 %v2327_v42, %s3871_s21 }
  0x7d   :  { %2334 = vrot.lane.b32.xlu0 %v2326_v44, %s3871_s21 }
  0x80   :  { %2340 = vrot.lane.b32.xlu1 %v2329_v45, %s3871_s21 }
  0x81   :  { %2338 = vrot.lane.b32.xlu0 %v2328_v35, %s3871_s21 }
  0x84   :  { %2344 = vrot.lane.b32.xlu1 %v2331_v39, %s3871_s21 }
  0x85   :  { %2342 = vrot.lane.b32.xlu0 %v2330_v46, %s3871_s21 }
  0x88   :  { %2348 = vrot.lane.b32.xlu1 %v2333_v16, %s3871_s21 }
  0x89   :  { %2346 = vrot.lane.b32.xlu0 %v2332_v17, %s3871_s21  ;;  %v3761_v17 = vld [vmem:[#allocation5 + $0x20] sm:$0xff]   ;;  %s3841_s21 = scalar_lea.vmem %s3334_s0, 128 }
  0x8a   :  { %p3842_p10 = scmp.ne.s32.totalorder %s3334_s0, %s3841_s21  ;;  %p3847_p12 = scmp.lt.s32.totalorder %s3841_s21, %s3841_s21 }
  0x8c   :  { %p3848_p13 = por %p3847_p12, %p3846_p11 }
  0x8e   :  { %p3849_p0 = pnand %p3848_p13, %p3842_p10 }
  0xae   :  { %v282_v28 = vpop.permute.xlu1 %281 }
  0xaf   :  { %v280_v47 = vpop.permute.xlu0 %279 }
  0xb2   :  { %v286_v37 = vpop.permute.xlu1 %285 }
  0xb3   :  { %v4194_v48 = vpop.permute.xlu0 %283 }
  0xb6   :  { %v260_v49 = vpop.permute.xlu1 %259 }
  0xb7   :  { %v256_v50 = vpop.permute.xlu0 %255  ;;  %v304_v4 = vsel %vm295_vm0, %v4018_v9, %v260_v49 }
  0xb8   :  { %v298_v51 = vsel %vm295_vm0, %v3993_v2, %v256_v50  ;;  %v326_v58 = vsel %vm320_vm1, %v304_v4, %v4194_v48 }
  0xb9   :  { %v322_v1 = vsel %vm320_vm1, %v298_v51, %v280_v47 }
  0xba   :  { %v262_v52 = vpop.permute.xlu1 %261 }
  0xbb   :  { %v307_v53 = vsel %vm295_vm0, %v4004_v5, %v262_v52  ;;  %v258_v54 = vpop.permute.xlu0 %257 }
  0xbc   :  { %v328_v59 = vsel %vm320_vm1, %v307_v53, %v286_v37  ;;  %v301_v61 = vsel %vm295_vm0, %v3985_v0, %v258_v54 }
  0xbd   :  { %v3353_v63 = vcombine.low %v326_v58, %v328_v59  ;;  %v324_v10 = vsel %vm320_vm1, %v301_v61, %v282_v28 }
  0xbe   :  { %v726_v13 = vpop.permute.xlu1 %725  ;;  %v3352_v14 = vcombine.low %v322_v1, %v324_v10 }
  0xbf   :  { %v724_v15 = vpop.permute.xlu0 %723  ;;  %v4216_v25 = vsel %vm295_vm0, %v3985_v0, %v726_v13 }
  0xc0   :  { %3505 = vmatprep.mubr.msk.bf16.mxu0 %vm393_vm2, %v3352_v14  ;;  %v4220_v29 = vsel %vm295_vm0, %v3993_v2, %v724_v15  ;;  %v796_v32 = vsel %vm320_vm1, %v4216_v25, %v282_v28 }
  0xc1   :  { %3506 = vmatmul.mubr.msk.bf16.vlgmr.msra.gmra.mrb[0].mxu0 %vm393_vm2, %v3353_v63  ;;  %v795_v2 = vsel %vm320_vm1, %v4220_v29, %v280_v47 }
  0xc2   :  { %v730_v24 = vpop.permute.xlu1 %729  ;;  %3549 = vmatpush3.bf16.msra.mxu0 %v4115_v21 }
  0xc3   :  { %v728_v19 = vpop.permute.xlu0 %727  ;;  %3550 = vmatprep.subr.bf16.mxu0 %v3758_v18  ;;  %v4231_v0 = vsel %vm295_vm0, %v4004_v5, %v730_v24 }
  0xc4   :  { %v4245_v5 = vsel %vm295_vm0, %v4018_v9, %v728_v19  ;;  %v798_v45 = vsel %vm320_vm1, %v4231_v0, %v286_v37 }
  0xc5   :  { %v797_v4 = vsel %vm320_vm1, %v4245_v5, %v4194_v48 }
  0xc6   :  { %v4227_v33 = vpop.permute.xlu1 %765  ;;  %3551 = vmatpush3.bf16.msra.mxu0 %v3758_v18 }
  0xc7   :  { %v806_v21 = vsel %vm393_vm2, %v796_v32, %v4227_v33  ;;  %v4237_v34 = vpop.permute.xlu0 %763  ;;  %3552 = vmatprep.subr.bf16.mxu0 %v3759_v20 }
  0xc8   :  { %v857_v38 = vrot.slane %v806_v21, %v4223_v30  ;;  %v804_v40 = vsel %vm393_vm2, %v795_v2, %v4237_v34 }
  0xc9   :  { %v833_v41 = vrot.slane %v804_v40, %v4223_v30  ;;  %v3763_v40 = vld [vmem:[#allocation5 + $0x30] sm:$0xff]  }
  0xca   :  { %v858_v42 = vcombine.high %v857_v38, %v857_v38  ;;  %v865_v44 = vrot.slane %v857_v38, %v4223_v30  ;;  %v4250_v35 = vpop.permute.xlu1 %769  ;;  %3553 = vmatpush3.bf16.msra.mxu0 %v3759_v20 }
  0xcb   :  { %v834_v39 = vcombine.high %v833_v41, %v833_v41  ;;  %v810_v46 = vsel %vm393_vm2, %v798_v45, %v4250_v35  ;;  %v4254_v16 = vpop.permute.xlu0 %767  ;;  %3554 = vmatprep.subr.bf16.mxu0 %v3760_v36  ;;  %v841_v47 = vrot.slane %v833_v41, %v4223_v30 }
  0xcc   :  { %v872_v9 = vrot.slane %v858_v42, %v4223_v30  ;;  %v873_v28 = vcombine.high %v865_v44, %v865_v44  ;;  %v905_v49 = vrot.slane %v810_v46, %v4223_v30  ;;  %v1027_v50 = vunpack.i.h.s16 %v865_v44 }
  0xcd   :  { %v848_v37 = vrot.slane %v834_v39, %v4223_v30  ;;  %v808_v54 = vsel %vm393_vm2, %v797_v4, %v4254_v16  ;;  %v849_v63 = vcombine.high %v841_v47, %v841_v47 }
  0xce   :  { %v1029_v51 = vunpack.i.h.s16 %v872_v9  ;;  %v906_v52 = vcombine.high %v905_v49, %v905_v49  ;;  %v913_v53 = vrot.slane %v905_v49, %v4223_v30  ;;  %v288_v56 = vpop.permute.xlu1 %287  ;;  %3555 = vmatpush3.bf16.msra.mxu0 %v3760_v36  ;;  %v874_v58 = vcombine.high %v872_v9, %v872_v9 }
  0xcf   :  { %v850_v57 = vcombine.high %v848_v37, %v848_v37  ;;  %v1031_v59 = vunpack.i.h.s16 %v873_v28  ;;  %v732_v61 = vpop.permute.xlu0 %731  ;;  %3556 = vmatprep.subr.bf16.mxu0 %v3761_v17  ;;  %v3376_v48 = vpack.i.b16 %v872_v9, %v1027_v50  ;;  %v881_v15 = vrot.slane %v808_v54, %v4223_v30 }
  0xd0   :  { %v920_v1 = vrot.slane %v906_v52, %v4223_v30  ;;  %v921_v10 = vcombine.high %v913_v53, %v913_v53  ;;  %v3377_v18 = vpack.i.b16 %v873_v28, %v1029_v51  ;;  %v1103_v32 = vcombine.low %v841_v47, %v848_v37  ;;  %v3764_v52 = vld [vmem:[#allocation5 + $0x38] sm:$0xff]  }
  0xd1   :  { %v3375_v13 = vpack.i.b16 %v865_v44, %v850_v57  ;;  %v3378_v14 = vpack.i.b16 %v874_v58, %v1031_v59  ;;  %v882_v21 = vcombine.high %v881_v15, %v881_v15  ;;  %v889_v2 = vrot.slane %v881_v15, %v4223_v30 }
  0xd2   :  { %v922_v22 = vcombine.high %v920_v1, %v920_v1  ;;  %v1043_v24 = vunpack.i.h.s16 %v920_v1  ;;  %v1045_v19 = vunpack.i.h.s16 %v921_v10  ;;  %v264_v20 = vpop.permute.xlu1 %263  ;;  %3557 = vmatpush3.bf16.msra.mxu0 %v3761_v17  ;;  %v4271_v36 = vsel %vm295_vm0, %v4081_v55, %v732_v61 }
  0xd3   :  { %v4273_v38 = vpop.permute.xlu0 %771  ;;  %3558 = vmatprep.subr.bf16.mxu0 %v3762_v62  ;;  %v1104_v41 = vcombine.low %v849_v63, %v3375_v13  ;;  %v1041_v42 = vunpack.i.h.s16 %v913_v53  ;;  %v799_v45 = vsel %vm320_vm1, %v4271_v36, %v288_v56  ;;  %v896_v46 = vrot.slane %v882_v21, %v4223_v30 }
  0xd4   :  { %v3381_v44 = vpack.i.b16 %v921_v10, %v1043_v24  ;;  %v3382_v39 = vpack.i.b16 %v922_v22, %v1045_v19  ;;  %v1106_v17 = vcombine.low %v3378_v14, %v889_v2  ;;  %v812_v9 = vsel %vm393_vm2, %v799_v45, %v4273_v38 }
  0xd5   :  { %v929_v28 = vrot.slane %v812_v9, %v4223_v30  ;;  %v1105_v49 = vcombine.low %v3376_v48, %v3377_v18  ;;  %v898_v50 = vcombine.high %v896_v46, %v896_v46  ;;  %v310_v4 = vsel %vm295_vm0, %v4081_v55, %v264_v20 }
  0xd6   :  { %v268_v47 = vpop.permute.xlu1 %267  ;;  %3559 = vmatpush3.bf16.msra.mxu0 %v3762_v62  ;;  %v1134_v37 = vrot.slane %v1106_v17, %v4223_v30  ;;  %v1113_v54 = vrot.slane %v1103_v32, %v4223_v30  ;;  %v3380_v57 = vpack.i.b16 %v920_v1, %v1041_v42  ;;  %v897_v58 = vcombine.high %v889_v2, %v889_v2 }
  0xd7   :  { %v266_v51 = vpop.permute.xlu0 %265  ;;  %3560 = vmatprep.subr.bf16.mxu0 %v3763_v40  ;;  %v930_v59 = vcombine.high %v929_v28, %v929_v28  ;;  %v1154_v61 = vcombine.low %v3381_v44, %v3382_v39  ;;  %v3379_v63 = vpack.i.b16 %v913_v53, %v898_v50  ;;  %v1120_v10 = vrot.slane %v1104_v41, %v4223_v30 }
  0xd8   :  { %v1127_v62 = vrot.slane %v1105_v49, %v4223_v30  ;;  %v4288_v48 = vrot.slane %v929_v28, %v4223_v30  ;;  %v313_v55 = vsel %vm295_vm0, %v4108_v11, %v266_v51  ;;  %v330_v14 = vsel %vm320_vm1, %v310_v4, %v288_v56 }
  0xd9   :  { %v4291_v13 = vrot.slane %v930_v59, %v4223_v30  ;;  %v1153_v15 = vcombine.low %v3379_v63, %v3380_v57  ;;  %v1135_v22 = vcombine.low %v1113_v54, %v1120_v10  ;;  %v1152_v32 = vcombine.low %v896_v46, %v897_v58 }
  0xda   :  { %v290_v1 = vpop.permute.xlu1 %289  ;;  %3561 = vmatpush3.bf16.msra.mxu0 %v3763_v40  ;;  %v1136_v24 = vcombine.low %v1127_v62, %v1134_v37  ;;  %v1176_v44 = vrot.slane %v1154_v61, %v4223_v30  ;;  %v316_v45 = vsel %vm295_vm0, %v4090_v60, %v268_v47  ;;  %v3879_v17 = vmov 0  }
  0xdb   :  { %v332_v53 = vsel %vm320_vm1, %v313_v55, %v290_v1  ;;  %v270_v18 = vpop.permute.xlu0 %269  ;;  %3562 = vmatprep.subr.bf16.mxu0 %v3764_v52  ;;  %v1155_v19 = vcombine.low %v4288_v48, %v4291_v13  ;;  %v1143_v40 = vrot.slane %v1135_v22, %v4223_v30  ;;  %v1169_v42 = vrot.slane %v1153_v15, %v4223_v30  ;;  %v3765_v15 = vld [vmem:[%s4999_s5] sm:$0xff]  }
  0xdc   :  { %v3354_v20 = vcombine.low %v330_v14, %v332_v53  ;;  %v319_v21 = vsel %vm295_vm0, %v4131_v27, %v270_v18  ;;  %v1150_v41 = vrot.slane %v1136_v24, %v4223_v30  ;;  %v1162_v28 = vrot.slane %v1152_v32, %v4223_v30 }
  0xdd   :  { %v1183_v2 = vrot.slane %v1155_v19, %v4223_v30  ;;  %v2351_v61 = vrot.slane %v3996_v3, 2  ;;  %v2350_v63 = vrot.slane %v4010_v7, 2  ;;  %v2353_v14 = vrot.slane %v4013_v8, 2 }
  0xde   :  { %v294_v56 = vpop.permute.xlu1 %293  ;;  %3509 = vmatprep.mubr.msk.bf16.mxu0 %vm393_vm2, %v3354_v20  ;;  %3563 = vmatpush3.bf16.msra.mxu0 %v3764_v52  ;;  %v1151_v4 = vcombine.low %v1143_v40, %v1150_v41  ;;  %v1184_v51 = vcombine.low %v1162_v28, %v1169_v42  ;;  %v2352_v53 = vrot.slane %v4025_v12, 2  ;;  %v2355_v18 = vrot.slane %v4137_v31, 2  ;;  %v3766_v28 = vld [vmem:[%s4999_s5 + $0x8] sm:$0xff]  }
  0xdf   :  { %v336_v39 = vsel %vm320_vm1, %v319_v21, %v294_v56  ;;  %v292_v46 = vpop.permute.xlu0 %291  ;;  %2852 = vmatprep.subr.bf16.mxu0 %v3879_v17  ;;  %v1185_v49 = vcombine.low %v1176_v44, %v1183_v2  ;;  %v946_v22 = vcombine.high %v4291_v13, %v4291_v13  ;;  %v2357_v2 = vrot.slane %v4151_v43, 2  ;;  %v3772_v43 = vld [vmem:[%s4999_s5 + $0x38] sm:$0xff]  }
  0xe0   :  { %v334_v9 = vsel %vm320_vm1, %v316_v45, %v292_v46  ;;  %v1192_v55 = vrot.slane %v1184_v51, %v4223_v30  ;;  %v2356_v40 = vrot.slane %v4122_v26, 2 }
  0xe1   :  { %v3355_v50 = vcombine.low %v334_v9, %v336_v39  ;;  %v1199_v54 = vrot.slane %v1185_v49, %v4223_v30 }
  0xe2   :  { %v4313_v37 = vpop.permute.xlu1 %773 }
  0xe3   :  { %3510 = vmatmul.mubr.msk.bf16.gmra.mrb[4].mxu0 %vm393_vm2, %v3355_v50  ;;  %v734_v52 = vpop.permute.xlu0 %733  ;;  %v1200_v20 = vcombine.low %v1192_v55, %v1199_v54 }
  0xe4   :  { %v4318_v47 = vsel %vm295_vm0, %v4108_v11, %v734_v52  ;;  %3564 = vmatprep.mubr.bf16.mxu0 %v1151_v4 }
  0xe5   :  { %v800_v57 = vsel %vm320_vm1, %v4318_v47, %v290_v1 }
  0xe6   :  { %v814_v58 = vsel %vm393_vm2, %v800_v57, %v4313_v37  ;;  %v738_v59 = vpop.permute.xlu1 %737 }
  0xe7   :  { %v953_v10 = vrot.slane %v814_v58, %v4223_v30  ;;  %v4330_v11 = vsel %vm295_vm0, %v4131_v27, %v738_v59  ;;  %v736_v62 = vpop.permute.xlu0 %735  ;;  %v2354_v27 = vrot.slane %v4100_v6, 2 }
  0xe8   :  { %v4336_v1 = vsel %vm295_vm0, %v4090_v60, %v736_v62  ;;  %v802_v60 = vsel %vm320_vm1, %v4330_v11, %v294_v56  ;;  %v945_v56 = vcombine.high %v4288_v48, %v4288_v48 }
  0xe9   :  { %v954_v24 = vcombine.high %v953_v10, %v953_v10  ;;  %v961_v19 = vrot.slane %v953_v10, %v4223_v30  ;;  %v801_v21 = vsel %vm320_vm1, %v4336_v1, %v292_v46 }
  0xea   :  { %v4349_v32 = vpop.permute.xlu1 %777 }
  0xeb   :  { %v968_v41 = vrot.slane %v954_v24, %v4223_v30  ;;  %v1055_v42 = vunpack.i.h.s16 %v961_v19  ;;  %v3383_v13 = vpack.i.b16 %v961_v19, %v946_v22  ;;  %v818_v44 = vsel %vm393_vm2, %v802_v60, %v4349_v32  ;;  %3565 = vmatmul.mubr.bf16.vlgmr.msra.gmra.mrb[8].mxu0 %v1200_v20  ;;  %v4358_v45 = vpop.permute.xlu0 %775  ;;  %v3767_v60 = vld [vmem:[%s4999_s5 + $0x10] sm:$0xff]  }
  0xec   :  { %v1001_v39 = vrot.slane %v818_v44, %v4223_v30  ;;  %2853 = vmatpush1.bf16.msra.mxu0 %v3765_v15  ;;  %v969_v46 = vcombine.high %v961_v19, %v961_v19  ;;  %v816_v9 = vsel %vm393_vm2, %v801_v21, %v4358_v45 }
  0xed   :  { %v1057_v49 = vunpack.i.h.s16 %v968_v41  ;;  %v970_v50 = vcombine.high %v968_v41, %v968_v41  ;;  %v977_v4 = vrot.slane %v816_v9, %v4223_v30  ;;  %2854 = vmatprep.subr.bf16.mxu0 %v3879_v17  ;;  %v3384_v51 = vpack.i.b16 %v968_v41, %v1055_v42 }
  0xee   :  { %v1002_v52 = vcombine.high %v1001_v39, %v1001_v39  ;;  %v1009_v48 = vrot.slane %v1001_v39, %v4223_v30  ;;  %v1059_v54 = vunpack.i.h.s16 %v969_v46  ;;  %v2337_v57 = vpop.permute.xlu1 %2336  ;;  %v4371_v58 = vcombine.low %v945_v56, %v3383_v13 }
  0xef   :  { %v978_v59 = vcombine.high %v977_v4, %v977_v4  ;;  %v985_v10 = vrot.slane %v977_v4, %v4223_v30  ;;  %v2361_v62 = vsel %vm320_vm1, %v4216_v25, %v2337_v57  ;;  %v2335_v55 = vpop.permute.xlu0 %2334  ;;  %v3385_v15 = vpack.i.b16 %v969_v46, %v1057_v49  ;;  %v3768_v57 = vld [vmem:[%s4999_s5 + $0x18] sm:$0xff]  }
  0xf0   :  { %v4377_v22 = vrot.slane %v1002_v52, %v4223_v30  ;;  %v4379_v24 = vcombine.high %v1009_v48, %v1009_v48  ;;  %v1069_v19 = vunpack.i.h.s16 %v1009_v48  ;;  %v3386_v20 = vpack.i.b16 %v970_v50, %v1059_v54  ;;  %2855 = vmatpush1.bf16.msra.mxu0 %v3766_v28 }
  0xf1   :  { %v992_v21 = vrot.slane %v978_v59, %v4223_v30  ;;  %v993_v41 = vcombine.high %v985_v10, %v985_v10  ;;  %v2375_v25 = vsel %vm393_vm2, %v2361_v62, %v4227_v33  ;;  %v2359_v42 = vsel %vm320_vm1, %v4220_v29, %v2335_v55  ;;  %2856 = vmatprep.subr.bf16.mxu0 %v3879_v17 }
  0xf2   :  { %v1018_v13 = vcombine.high %v4377_v22, %v4377_v22  ;;  %v1071_v44 = vunpack.i.h.s16 %v4377_v22  ;;  %v1073_v56 = vunpack.i.h.s16 %v4379_v24  ;;  %v4395_v39 = vpack.i.b16 %v4377_v22, %v1069_v19  ;;  %v2341_v46 = vpop.permute.xlu1 %2340 }
  0xf3   :  { %v994_v9 = vcombine.high %v992_v21, %v992_v21  ;;  %v1203_v28 = vcombine.low %v3386_v20, %v985_v10  ;;  %v4397_v49 = vcombine.low %v992_v21, %v993_v41  ;;  %v2414_v29 = vcombine.low %v2375_v25, %v2351_v61  ;;  %v2339_v33 = vpop.permute.xlu0 %2338 }
  0xf4   :  { %v4402_v50 = vpack.i.b16 %v4379_v24, %v1071_v44  ;;  %v2374_v4 = vsel %vm393_vm2, %v2359_v42, %v4237_v34  ;;  %v2365_v52 = vsel %vm320_vm1, %v4231_v0, %v2341_v46  ;;  %2857 = vmatpush1.bf16.msra.mxu0 %v3767_v60  ;;  %v2363_v54 = vsel %vm320_vm1, %v4245_v5, %v2339_v33 }
  0xf5   :  { %v4413_v3 = vpack.i.b16 %v1009_v48, %v994_v9  ;;  %v4416_v61 = vrot.slane %v1203_v28, %v4223_v30  ;;  %v2421_v59 = vrot.slane %v2414_v29, %v4223_v30  ;;  %v2390_v34 = vcombine.low %v2374_v4, %v2350_v63  ;;  %2858 = vmatprep.subr.bf16.mxu0 %v3879_v17 }
  0xf6   :  { %v2377_v0 = vsel %vm393_vm2, %v2365_v52, %v4250_v35  ;;  %v2376_v5 = vsel %vm393_vm2, %v2363_v54, %v4254_v16  ;;  %v2345_v10 = vpop.permute.xlu1 %2344  ;;  %v1202_v62 = vcombine.low %v3384_v51, %v3385_v15  ;;  %v1211_v48 = vrot.slane %v4371_v58, %v4223_v30  ;;  %v3769_v15 = vld [vmem:[%s4999_s5 + $0x20] sm:$0xff]  }
  0xf7   :  { %v2422_v55 = vcombine.high %v2421_v59, %v2421_v59  ;;  %v2429_v19 = vrot.slane %v2421_v59, %v4223_v30  ;;  %v2397_v20 = vrot.slane %v2390_v34, %v4223_v30  ;;  %v2462_v7 = vcombine.low %v2377_v0, %v2353_v14  ;;  %v2343_v63 = vpop.permute.xlu0 %2342 }
  0xf8   :  { %v2438_v35 = vcombine.low %v2376_v5, %v2352_v53  ;;  %v2369_v16 = vsel %vm320_vm1, %v4318_v47, %v2345_v10  ;;  %2859 = vmatpush1.bf16.msra.mxu0 %v3768_v57  ;;  %v2367_v51 = vsel %vm320_vm1, %v4271_v36, %v2343_v63  ;;  %v1218_v60 = vrot.slane %v1202_v62, %v4223_v30 }
  0xf9   :  { %v2436_v8 = vrot.slane %v2422_v55, %v4223_v30  ;;  %v2437_v14 = vcombine.high %v2429_v19, %v2429_v19  ;;  %v2398_v21 = vcombine.high %v2397_v20, %v2397_v20  ;;  %v2405_v12 = vrot.slane %v2397_v20, %v4223_v30  ;;  %2860 = vmatprep.subr.bf16.mxu0 %v3879_v17 }
  0xfa   :  { %v2469_v47 = vrot.slane %v2462_v7, %v4223_v30  ;;  %v2445_v53 = vrot.slane %v2438_v35, %v4223_v30  ;;  %v2379_v36 = vsel %vm393_vm2, %v2369_v16, %v4313_v37  ;;  %v2378_v41 = vsel %vm393_vm2, %v2367_v51, %v4273_v38  ;;  %v3770_v37 = vld [vmem:[%s4999_s5 + $0x28] sm:$0xff]   ;;  %v2349_v31 = vpop.permute.xlu1 %2348  ;;  %v3771_v7 = vld [vmem:[%s4999_s5 + $0x30] sm:$0xff]  }
  0xfb   :  { %v4451_v25 = vcombine.low %v2436_v8, %v2437_v14  ;;  %v2412_v42 = vrot.slane %v2398_v21, %v4223_v30  ;;  %v2413_v44 = vcombine.high %v2405_v12, %v2405_v12  ;;  %v2510_v46 = vcombine.low %v2379_v36, %v2355_v18  ;;  %v2347_v55 = vpop.permute.xlu0 %2346 }
  0xfc   :  { %v2470_v9 = vcombine.high %v2469_v47, %v2469_v47  ;;  %v2477_v28 = vrot.slane %v2469_v47, %v4223_v30  ;;  %v2446_v29 = vcombine.high %v2445_v53, %v2445_v53  ;;  %v2453_v33 = vrot.slane %v2445_v53, %v4223_v30  ;;  %2861 = vmatpush1.bf16.msra.mxu0 %v3769_v15 }
  0xfd   :  { %v2582_v38 = vcombine.low %v2405_v12, %v2412_v42  ;;  %v2583_v4 = vcombine.low %v2413_v44, %v2429_v19  ;;  %v2517_v52 = vrot.slane %v2510_v46, %v4223_v30  ;;  %v2486_v54 = vcombine.low %v2378_v41, %v2354_v27  ;;  %2862 = vmatprep.subr.bf16.mxu0 %v3879_v17 }
  0xfe   :  { %v2484_v18 = vrot.slane %v2470_v9, %v4223_v30  ;;  %v2485_v57 = vcombine.high %v2477_v28, %v2477_v28  ;;  %v2460_v59 = vrot.slane %v2446_v29, %v4223_v30  ;;  %v2461_v34 = vcombine.high %v2453_v33, %v2453_v33 }
  0xff   :  { %v4468_v0 = vrot.slane %v2582_v38, %v4223_v30  ;;  %v2518_v5 = vcombine.high %v2517_v52, %v2517_v52  ;;  %v2525_v10 = vrot.slane %v2517_v52, %v4223_v30  ;;  %v2493_v62 = vrot.slane %v2486_v54, %v4223_v30 }
 0x100   :  { %v4472_v6 = vcombine.low %v2484_v18, %v2485_v57  ;;  %v2585_v27 = vcombine.low %v2453_v33, %v2460_v59  ;;  %v2648_v19 = vcombine.low %v2461_v34, %v2477_v28  ;;  %v2373_v20 = vsel %vm320_vm1, %v4330_v11, %v2349_v31  ;;  %2863 = vmatpush1.bf16.msra.mxu0 %v3770_v37 }
 0x101   :  { %v2532_v63 = vrot.slane %v2518_v5, %v4223_v30  ;;  %v2533_v35 = vcombine.high %v2525_v10, %v2525_v10  ;;  %v2494_v16 = vcombine.high %v2493_v62, %v2493_v62  ;;  %v2501_v51 = vrot.slane %v2493_v62, %v4223_v30  ;;  %2864 = vmatprep.subr.bf16.mxu0 %v3879_v17 }
 0x102   :  { %v2613_v15 = vrot.slane %v2585_v27, %v4223_v30  ;;  %v2381_v8 = vsel %vm393_vm2, %v2373_v20, %v4349_v32  ;;  %v2371_v11 = vsel %vm320_vm1, %v4336_v1, %v2347_v55  ;;  %v1232_v14 = vrot.slane %v4397_v49, %v4223_v30 }
 0x103   :  { %v2714_v21 = vcombine.low %v2532_v63, %v2533_v35  ;;  %v2508_v12 = vrot.slane %v2494_v16, %v4223_v30  ;;  %v2509_v47 = vcombine.high %v2501_v51, %v2501_v51  ;;  %v2558_v53 = vcombine.low %v2381_v8, %v2357_v2 }
 0x104   :  { %v2380_v36 = vsel %vm393_vm2, %v2371_v11, %v4358_v45  ;;  %v1233_v32 = vcombine.low %v1211_v48, %v1218_v60  ;;  %v1234_v41 = vcombine.low %v4416_v61, %v1232_v14  ;;  %v3390_v1 = vpack.i.b16 %v1018_v13, %v1073_v56  ;;  %2865 = vmatpush1.bf16.msra.mxu0 %v3771_v7 }
 0x105   :  { %v2650_v2 = vcombine.low %v2501_v51, %v2508_v12  ;;  %v2651_v49 = vcombine.low %v2509_v47, %v2525_v10  ;;  %v2565_v45 = vrot.slane %v2558_v53, %v4223_v30  ;;  %v2534_v58 = vcombine.low %v2380_v36, %v2356_v40  ;;  %2866 = vmatprep.subr.bf16.mxu0 %v3879_v17 }
 0x106   :  { %v1241_v24 = vrot.slane %v1233_v32, %v4223_v30  ;;  %v1248_v61 = vrot.slane %v1234_v41, %v4223_v30  ;;  %v1250_v22 = vcombine.low %v4413_v3, %v4395_v39  ;;  %v1251_v13 = vcombine.low %v4402_v50, %v3390_v1  ;;  %v3773_v39 = vld [vmem:[%s4999_s5 + $0x40] sm:$0xff]  }
 0x107   :  { %v2672_v56 = vrot.slane %v2650_v2, %v4223_v30  ;;  %v2566_v48 = vcombine.high %v2565_v45, %v2565_v45  ;;  %v2573_v60 = vrot.slane %v2565_v45, %v4223_v30  ;;  %v2541_v42 = vrot.slane %v2534_v58, %v4223_v30 }
 0x108   :  { %v1249_v26 = vcombine.low %v1241_v24, %v1248_v61  ;;  %v1258_v40 = vrot.slane %v1250_v22, %v4223_v30  ;;  %v1265_v44 = vrot.slane %v1251_v13, %v4223_v30  ;;  %2867 = vmatpush1.bf16.msra.mxu0 %v3772_v43  ;;  %v2599_v46 = vrot.slane %v2583_v4, %v4223_v30  ;;  %v91_v61 = vld [vmem:[#allocation7] sm:$0xff]  ;;  %v92_v22 = vld [vmem:[#allocation7 + $0x8] sm:$0xff]  ;;  %v93_v13 = vld [vmem:[#allocation7 + $0x10] sm:$0xff] }
 0x109   :  { %v2580_v50 = vrot.slane %v2566_v48, %v4223_v30  ;;  %v2581_v3 = vcombine.high %v2573_v60, %v2573_v60  ;;  %v2542_v9 = vcombine.high %v2541_v42, %v2541_v42  ;;  %v2549_v28 = vrot.slane %v2541_v42, %v4223_v30  ;;  %2868 = vmatprep.subr.bf16.mxu0 %v3879_v17 }
 0x10a   :  { %3568 = vmatprep.mubr.bf16.mxu0 %v1249_v26  ;;  %v1266_v29 = vcombine.low %v1258_v40, %v1265_v44  ;;  %v2606_v33 = vrot.slane %v4451_v25, %v4223_v30  ;;  %v2614_v37 = vcombine.low %v4468_v0, %v2599_v46  ;;  %v2615_v38 = vcombine.high %v4468_v0, %v2599_v46  ;;  %v3774_v25 = vld [vmem:[%s4999_s5 + $0x48] sm:$0xff]   ;;  %v95_v26 = vld [vmem:[#allocation7 + $0x20] sm:$0xff]  ;;  %v97_v46 = vld [vmem:[#allocation7 + $0x30] sm:$0xff] }
 0x10b   :  { %v2717_v4 = vcombine.low %v2580_v50, %v2581_v3  ;;  %v2556_v52 = vrot.slane %v2542_v9, %v4223_v30  ;;  %v2557_v54 = vcombine.high %v2549_v28, %v2549_v28  ;;  %v2658_v31 = vrot.slane %v2648_v19, %v4223_v30  ;;  %v96_v40 = vld [vmem:[#allocation7 + $0x28] sm:$0xff]  ;;  %v99_v3 = vld [vmem:[#allocation7 + $0x40] sm:$0xff] }
 0x10c   :  { %v1273_v18 = vrot.slane %v1266_v29, %v4223_v30  ;;  %v2616_v57 = vcombine.low %v2606_v33, %v2613_v15  ;;  %v2617_v59 = vcombine.high %v2606_v33, %v2613_v15  ;;  %v2631_v34 = vrot.slane %v2615_v38, %v4223_v30  ;;  %2869 = vmatpush1.bf16.msra.mxu0 %v3773_v39  ;;  %v98_v39 = vld [vmem:[#allocation7 + $0x38] sm:$0xff]  ;;  %v100_v9 = vld [vmem:[#allocation7 + $0x48] sm:$0xff]  ;;  %v101_v29 = vld [vmem:[#allocation7 + $0x50] sm:$0xff] }
 0x10d   :  { %v2715_v5 = vcombine.low %v2549_v28, %v2556_v52  ;;  %v2716_v10 = vcombine.low %v2557_v54, %v2573_v60  ;;  %2870 = vmatprep.subr.bf16.mxu0 %v3879_v17  ;;  %v2624_v0 = vrot.slane %v2614_v37, %v4223_v30  ;;  %v2665_v62 = vrot.slane %v4472_v6, %v4223_v30  ;;  %v94_v60 = vld [vmem:[#allocation7 + $0x18] sm:$0xff]  ;;  %v103_v38 = vld [vmem:[#allocation7 + $0x60] sm:$0xff]  ;;  %v105_v54 = vld [vmem:[#allocation7 + $0x70] sm:$0xff] }
 0x10e   :  { %3569 = vmatmul.mubr.bf16.gmra.mrb[12].mxu0 %v1273_v18  ;;  %v2645_v55 = vrot.slane %v2617_v59, %v4223_v30  ;;  %v2638_v27 = vrot.slane %v2616_v57, %v4223_v30  ;;  %v2679_v19 = vrot.slane %v2651_v49, %v4223_v30  ;;  %v2724_v20 = vrot.slane %v2714_v21, %v4223_v30  ;;  %v102_v33 = vld [vmem:[#allocation7 + $0x58] sm:$0xff] }
 0x10f   :  { %v2731_v7 = vrot.slane %v2715_v5, %v4223_v30  ;;  %v2681_v63 = vcombine.high %v2658_v31, %v2665_v62  ;;  %v2680_v35 = vcombine.low %v2658_v31, %v2665_v62  ;;  %v2738_v17 = vrot.slane %v2716_v10, %v4223_v30  ;;  %v106_v31 = vld [vmem:[#allocation7 + $0x78] sm:$0xff] }
 0x110   :  { %v2647_v16 = vcombine.low %v2631_v34, %v2645_v55  ;;  %2871 = vmatpush1.bf16.msra.mxu0 %v3774_v25  ;;  %v2646_v51 = vcombine.low %v2624_v0, %v2638_v27  ;;  %v2683_v15 = vcombine.high %v2672_v56, %v2679_v19  ;;  %v2682_v6 = vcombine.low %v2672_v56, %v2679_v19 }
 0x111   :  { %v2697_v8 = vrot.slane %v2681_v63, %v4223_v30  ;;  %v2745_v11 = vrot.slane %v2717_v4, %v4223_v30  ;;  %v2747_v14 = vcombine.high %v2724_v20, %v2731_v7  ;;  %v2690_v12 = vrot.slane %v2680_v35, %v4223_v30  ;;  %v104_v4 = vld [vmem:[#allocation7 + $0x68] sm:$0xff] }
 0x112   :  { %3416 = vmatprep.mubr.msk.bf16.mxu0 %vm295_vm0, %v2647_v16  ;;  %v2711_v21 = vrot.slane %v2683_v15, %v4223_v30  ;;  %v2704_v47 = vrot.slane %v2682_v6, %v4223_v30  ;;  %v2746_v53 = vcombine.low %v2724_v20, %v2731_v7  ;;  %v3880_v56 = vmov 0.0|0.0  }
 0x113   :  { %v2749_v36 = vcombine.high %v2738_v17, %v2745_v11  ;;  %v2763_v32 = vrot.slane %v2747_v14, %v4223_v30  ;;  %v2748_v41 = vcombine.low %v2738_v17, %v2745_v11  ;;  %3642 = vmatprep.subr.bf16.mxu1 %v3880_v56  ;;  %v3643_v48 = vpack.c.bf16 %v92_v22, %v91_v61  ;;  %v4574_v11 = vld [vmem:[%s4996_s2] ss:$0 sm:$0xff] }
 0x114   :  { %v2713_v1 = vcombine.low %v2697_v8, %v2711_v21  ;;  %v2712_v43 = vcombine.low %v2690_v12, %v2704_v47  ;;  %v2756_v2 = vrot.slane %v2746_v53, %v4223_v30  ;;  %v3646_v42 = vpack.c.bf16 %v94_v60, %v93_v13 }
 0x115   :  { %v2777_v49 = vrot.slane %v2749_v36, %v4223_v30  ;;  %v2770_v45 = vrot.slane %v2748_v41, %v4223_v30  ;;  %3644 = vmatpush3.bf16.msra.mxu1 %v3643_v48  ;;  %v3649_v44 = vpack.c.bf16 %v96_v40, %v95_v26  ;;  %v3652_v50 = vpack.c.bf16 %v98_v39, %v97_v46 }
 0x116   :  { %2885 = vmatmul.mubr.bf16.vlgmr.msra.gmra.mrb[16].mxu0 %v2646_v51  ;;  %3645 = vmatprep.subr.bf16.mxu1 %v3880_v56  ;;  %v3655_v28 = vpack.c.bf16 %v100_v9, %v99_v3  ;;  %v3658_v37 = vpack.c.bf16 %v102_v33, %v101_v29  ;;  %v3661_v52 = vpack.c.bf16 %v104_v4, %v103_v38  ;;  %v3882_v57 = vmov 0.0   ;;  %v4587_v38 = vld [vmem:[#allocation7 + $0x88] sm:$0xff] }
 0x117   :  { %3417 = vmatprep.mubr.msk.bf16.mxu0 %vm295_vm0, %v2713_v1  ;;  %v2779_v58 = vcombine.low %v2763_v32, %v2777_v49  ;;  %v2778_v24 = vcombine.low %v2756_v2, %v2770_v45  ;;  %v3664_v18 = vpack.c.bf16 %v106_v31, %v105_v54  ;;  %3545 = vmatprep.mubr.msk.f32.mxu1 %vm3881_vm3, %v3882_v57  ;;  %v3883_v40 = vmov 1983009808   ;;  %v4589_v31 = vld [vmem:[#allocation7 + $0x90] sm:$0xff] }
 0x119   :  { %3647 = vmatpush3.bf16.msra.mxu1 %v3646_v42 }
 0x11a   :  { %3648 = vmatprep.subr.bf16.mxu1 %v3880_v56 }
 0x11d   :  { %3650 = vmatpush3.bf16.msra.mxu1 %v3649_v44  ;;  %v2917_v44 = vunpack.c.l.s4 %v3883_v40 }
 0x11e   :  { %2893 = vmatmul.mubr.bf16.gmra.mrb[20].mxu0 %v2712_v43  ;;  %3651 = vmatprep.subr.bf16.mxu1 %v3880_v56 }
 0x11f   :  { %3418 = vmatprep.mubr.msk.bf16.mxu0 %vm295_vm0, %v2779_v58  ;;  %v2918_v4 = vunpack.c.0.s8 %v2917_v44 }
 0x121   :  { %3653 = vmatpush3.bf16.msra.mxu1 %v3652_v50 }
 0x122   :  { %3654 = vmatprep.subr.bf16.mxu1 %v3880_v56 }
 0x125   :  { %3656 = vmatpush3.bf16.msra.mxu1 %v3655_v28 }
 0x126   :  { %2901 = vmatmul.mubr.bf16.gmra.mrb[24].mxu0 %v2778_v24  ;;  %3657 = vmatprep.subr.bf16.mxu1 %v3880_v56 }
 0x129   :  { %3659 = vmatpush3.bf16.msra.mxu1 %v3658_v37  ;;  %v4585_v37 = vld [vmem:[#allocation7 + $0x80] sm:$0xff] }
 0x12a   :  { %3660 = vmatprep.subr.bf16.mxu1 %v3880_v56 }
 0x12d   :  { %3662 = vmatpush3.bf16.msra.mxu1 %v3661_v52 }
 0x12e   :  { %3663 = vmatprep.subr.bf16.mxu1 %v3880_v56 }
 0x131   :  { %3665 = vmatpush3.bf16.msra.mxu1 %v3664_v18  ;;  %v4591_v18 = vld [vmem:[#allocation7 + $0x98] sm:$0xff] }
 0x132   :  { %3666 = vmatprep.subr.bf16.mxu1 %v3880_v56 }
 0x194   :  { %v3507_v59 = vpop.f32.mrb[0].mxu0 }
 0x195   :  { %v483_v34 = vrot.slane %v3507_v59, 4  ;;  %v440_v25 = vpop.f32.mrb[1].mxu0 }
 0x196   :  { %v471_v5 = vrot.slane %v440_v25, 4  ;;  %v3508_v10 = vpop.f32.mrb[2].mxu0 }
 0x197   :  { %v484_v0 = vmax.f32 %v3507_v59, %v483_v34  ;;  %v489_v62 = vrot.slane %v3508_v10, 4  ;;  %v443_v55 = vpop.f32.mrb[3].mxu0  ;;  %v4593_v59 = vld [vmem:[#allocation7 + $0xa0] sm:$0xff] }
 0x198   :  { %v472_v27 = vmax.f32 %v440_v25, %v471_v5  ;;  %v477_v19 = vrot.slane %v443_v55, 4  ;;  %v4595_v5 = vld [vmem:[#allocation7 + $0xa8] sm:$0xff] }
 0x199   :  { %v485_v20 = vrot.slane %v484_v0, 2  ;;  %v490_v7 = vmax.f32 %v3508_v10, %v489_v62  ;;  %v4597_v10 = vld [vmem:[#allocation7 + $0xb0] sm:$0xff] }
 0x19a   :  { %v473_v63 = vrot.slane %v472_v27, 2  ;;  %v478_v35 = vmax.f32 %v443_v55, %v477_v19 }
 0x19b   :  { %v486_v17 = vmax.f32 %v484_v0, %v485_v20  ;;  %v491_v16 = vrot.slane %v490_v7, 2  ;;  %v4599_v0 = vld [vmem:[#allocation7 + $0xb8] sm:$0xff] }
 0x19c   :  { %v474_v51 = vmax.f32 %v472_v27, %v473_v63  ;;  %v479_v15 = vrot.slane %v478_v35, 2  ;;  %v3667_v27 = vpack.c.bf16 %v4587_v38, %v4585_v37  ;;  %v4606_v63 = vsub.s32 %v2918_v4, %v4210_v23  ;;  %v4617_v23 = vld [vmem:[#allocation7 + $0xd0] sm:$0xff] }
 0x19d   :  { %v487_v6 = vrot.slane %v486_v17, 1  ;;  %v492_v8 = vmax.f32 %v490_v7, %v491_v16  ;;  %v3670_v7 = vpack.c.bf16 %v4591_v18, %v4589_v31 }
 0x19e   :  { %v475_v14 = vrot.slane %v474_v51, 1  ;;  %v480_v21 = vmax.f32 %v478_v35, %v479_v15  ;;  %v3676_v15 = vpack.c.bf16 %v4599_v0, %v4597_v10 }
 0x19f   :  { %v488_v12 = vmax.f32 %v486_v17, %v487_v6  ;;  %v493_v47 = vrot.slane %v492_v8, 1  ;;  %v4612_v6 = vld [vmem:[#allocation7 + $0xc0] sm:$0xff] }
 0x1a0   :  { %v476_v53 = vmax.f32 %v474_v51, %v475_v14  ;;  %v481_v36 = vrot.slane %v480_v21, 1  ;;  %v3673_v51 = vpack.c.bf16 %v4595_v5, %v4593_v59 }
 0x1a1   :  { %v527_v32 = vadd.f32 %v4574_v11, %v488_v12  ;;  %v494_v41 = vmax.f32 %v492_v8, %v493_v47 }
 0x1a2   :  { %v482_v1 = vmax.f32 %v480_v21, %v481_v36  ;;  %v525_v2 = vadd.f32 %v4574_v11, %v476_v53  ;;  %v4615_v53 = vld [vmem:[#allocation7 + $0xc8] sm:$0xff]  ;;  %v4619_v36 = vld [vmem:[#allocation7 + $0xd8] sm:$0xff] }
 0x1a3   :  { %v528_v43 = vadd.f32 %v4574_v11, %v494_v41  ;;  %v535_v45 = vmax.f32 %v527_v32, 0.0 }
 0x1a4   :  { %v526_v49 = vadd.f32 %v4574_v11, %v482_v1  ;;  %v533_v61 = vmax.f32 %v525_v2, 0.0 }
 0x1a5   :  { %v536_v58 = vmax.f32 %v528_v43, 0.0  ;;  %v552_v13 = vrot.slane %v535_v45, 6 }
 0x1a6   :  { %v534_v24 = vmax.f32 %v526_v49, 0.0 }
 0x1a7   :  { %v555_v48 = vrot.slane %v536_v58, 5 }
 0x1a8   :  { %v549_v22 = vrot.slane %v534_v24, 7 }
 0x1aa   :  { %v551_v60 = vsel %vm550_vm4, %v549_v22, %v533_v61 }
 0x1ab   :  { %v554_v42 = vsel %vm553_vm5, %v552_v13, %v551_v60  ;;  %v3682_v60 = vpack.c.bf16 %v4619_v36, %v4617_v23 }
 0x1ac   :  { %v4583_v26 = vsel %vm556_vm6, %v555_v48, %v554_v42  ;;  %v3679_v48 = vpack.c.bf16 %v4615_v53, %v4612_v6 }
 0x1b6   :  { %v3511_v46 = vpop.f32.mrb[4].mxu0 }
 0x1b7   :  { %v507_v39 = vrot.slane %v3511_v46, 4  ;;  %v456_v50 = vpop.f32.mrb[5].mxu0 }
 0x1b8   :  { %v495_v3 = vrot.slane %v456_v50, 4  ;;  %v3512_v9 = vpop.f32.mrb[6].mxu0 }
 0x1b9   :  { %v508_v28 = vmax.f32 %v3511_v46, %v507_v39  ;;  %v513_v29 = vrot.slane %v3512_v9, 4  ;;  %v459_v33 = vpop.f32.mrb[7].mxu0 }
 0x1ba   :  { %v496_v52 = vmax.f32 %v456_v50, %v495_v3  ;;  %v501_v54 = vrot.slane %v459_v33, 4 }
 0x1bb   :  { %v509_v34 = vrot.slane %v508_v28, 2  ;;  %v514_v25 = vmax.f32 %v3512_v9, %v513_v29 }
 0x1bc   :  { %v497_v62 = vrot.slane %v496_v52, 2  ;;  %v502_v55 = vmax.f32 %v459_v33, %v501_v54 }
 0x1bd   :  { %v510_v19 = vmax.f32 %v508_v28, %v509_v34  ;;  %v515_v20 = vrot.slane %v514_v25, 2 }
 0x1be   :  { %v498_v35 = vmax.f32 %v496_v52, %v497_v62  ;;  %v503_v17 = vrot.slane %v502_v55, 2  ;;  %v3566_v16 = vpop.f32.mrb[8].mxu0 }
 0x1bf   :  { %v511_v8 = vrot.slane %v510_v19, 1  ;;  %v516_v14 = vmax.f32 %v514_v25, %v515_v20  ;;  %v1495_v21 = vcombine.high %v3566_v16, %v3566_v16  ;;  %v1502_v12 = vrot.slane %v3566_v16, %v4223_v30  ;;  %v1360_v47 = vpop.f32.mrb[9].mxu0 }
 0x1c0   :  { %v499_v32 = vrot.slane %v498_v35, 1  ;;  %v504_v41 = vmax.f32 %v502_v55, %v503_v17  ;;  %v1397_v1 = vcombine.high %v1360_v47, %v1360_v47  ;;  %v1404_v43 = vrot.slane %v1360_v47, %v4223_v30  ;;  %v3567_v2 = vpop.f32.mrb[10].mxu0 }
 0x1c1   :  { %v512_v49 = vmax.f32 %v510_v19, %v511_v8  ;;  %v517_v45 = vrot.slane %v516_v14, 1  ;;  %v1509_v58 = vrot.slane %v1495_v21, %v4223_v30  ;;  %v1510_v24 = vcombine.high %v1502_v12, %v1502_v12  ;;  %v4623_v61 = vpop.f32.mrb[11].mxu0 }
 0x1c2   :  { %v500_v22 = vmax.f32 %v498_v35, %v499_v32  ;;  %v505_v13 = vrot.slane %v504_v41, 1  ;;  %v1411_v46 = vrot.slane %v1397_v1, %v4223_v30  ;;  %v1518_v3 = vrot.slane %v1502_v12, %v4223_v30 }
 0x1c3   :  { %v4630_v42 = vadd.f32 %v4574_v11, %v512_v49  ;;  %v1511_v40 = vcombine.high %v1509_v58, %v1509_v58  ;;  %v4633_v44 = vrot.slane %v1509_v58, %v4223_v30  ;;  %v1532_v9 = vrot.slane %v1510_v24, %v4223_v30 }
 0x1c4   :  { %v529_v39 = vadd.f32 %v4574_v11, %v500_v22  ;;  %v506_v50 = vmax.f32 %v504_v41, %v505_v13  ;;  %v4639_v28 = vmax.f32 %v516_v14, %v517_v45  ;;  %v1412_v4 = vcombine.high %v1404_v43, %v1404_v43 }
 0x1c5   :  { %v1539_v29 = vrot.slane %v1511_v40, %v4223_v30  ;;  %v1541_v33 = vcombine.high %v4633_v44, %v4633_v44  ;;  %v1837_v34 = vcombine.low %v1518_v3, %v1532_v9  ;;  %v3401_v25 = vcombine.high %v1518_v3, %v1532_v9 }
 0x1c6   :  { %v537_v52 = vmax.f32 %v529_v39, 0.0  ;;  %v530_v54 = vadd.f32 %v4574_v11, %v506_v50  ;;  %v539_v62 = vmax.f32 %v4630_v42, 0.0  ;;  %v1866_v55 = vrot.slane %v4633_v44, %v4223_v30 }
 0x1c7   :  { %v1413_v19 = vcombine.high %v1411_v46, %v1411_v46  ;;  %v1427_v20 = vrot.slane %v1411_v46, %v4223_v30  ;;  %v1884_v16 = vcombine.low %v1539_v29, %v1541_v33  ;;  %v1420_v8 = vrot.slane %v1404_v43, %v4223_v30 }
 0x1c8   :  { %v4649_v35 = vrot.slane %v537_v52, 4  ;;  %v538_v17 = vmax.f32 %v530_v54, 0.0  ;;  %v4653_v14 = vrot.slane %v1837_v34, %v4223_v30  ;;  %v1434_v21 = vrot.slane %v1412_v4, %v4223_v30 }
 0x1c9   :  { %v1441_v12 = vrot.slane %v1413_v19, %v4223_v30  ;;  %v1443_v47 = vcombine.high %v1427_v20, %v1427_v20  ;;  %v1859_v32 = vrot.slane %v3401_v25, %v4223_v30  ;;  %v1543_v41 = vcombine.high %v1539_v29, %v1539_v29 }
 0x1ca   :  { %v1544_v1 = vcombine.high %v3567_v2, %v3567_v2  ;;  %v1551_v49 = vrot.slane %v3567_v2, %v4223_v30  ;;  %v4659_v45 = vrot.slane %v538_v17, 3  ;;  %v1740_v58 = vcombine.low %v1420_v8, %v1434_v21 }
 0x1cb   :  { %v3399_v24 = vcombine.high %v1420_v8, %v1434_v21  ;;  %v1742_v43 = vcombine.low %v1427_v20, %v1441_v12  ;;  %v1770_v22 = vrot.slane %v1443_v47, %v4223_v30  ;;  %v1893_v2 = vrot.slane %v1884_v16, %v4223_v30 }
 0x1cc   :  { %v1558_v13 = vrot.slane %v1544_v1, %v4223_v30  ;;  %v1559_v40 = vcombine.high %v1551_v49, %v1551_v49  ;;  %v1567_v44 = vrot.slane %v1551_v49, %v4223_v30  ;;  %v1749_v46 = vrot.slane %v1740_v58, %v4223_v30 }
 0x1cd   :  { %v1756_v39 = vrot.slane %v3399_v24, %v4223_v30  ;;  %v1763_v50 = vrot.slane %v1742_v43, %v4223_v30  ;;  %v1445_v34 = vcombine.high %v1441_v12, %v1441_v12  ;;  %v1446_v17 = vcombine.high %v4623_v61, %v4623_v61 }
 0x1ce   :  { %v1560_v3 = vcombine.high %v1558_v13, %v1558_v13  ;;  %v1574_v9 = vrot.slane %v1558_v13, %v4223_v30  ;;  %v1581_v29 = vrot.slane %v1559_v40, %v4223_v30  ;;  %v1589_v33 = vcombine.high %v1567_v44, %v1567_v44 }
 0x1cf   :  { %v1771_v4 = vcombine.low %v1749_v46, %v1756_v39  ;;  %v1772_v52 = vcombine.low %v1763_v50, %v1770_v22  ;;  %v1885_v54 = vcombine.low %v1543_v41, %v1567_v44  ;;  %v1453_v47 = vrot.slane %v4623_v61, %v4223_v30 }
 0x1d0   :  { %v1588_v25 = vrot.slane %v1560_v3, %v4223_v30  ;;  %v1591_v19 = vcombine.high %v1581_v29, %v1581_v29  ;;  %v1886_v20 = vcombine.low %v1581_v29, %v1589_v33  ;;  %v1460_v43 = vrot.slane %v1446_v17, %v4223_v30 }
 0x1d1   :  { %v1779_v16 = vrot.slane %v1771_v4, %v4223_v30  ;;  %v1786_v8 = vrot.slane %v1772_v52, %v4223_v30  ;;  %v1900_v21 = vrot.slane %v1885_v54, %v4223_v30  ;;  %v1461_v22 = vcombine.high %v1453_v47, %v1453_v47 }
 0x1d2   :  { %v1907_v12 = vrot.slane %v1886_v20, %v4223_v30  ;;  %v1914_v41 = vrot.slane %v1591_v19, %v4223_v30  ;;  %v1932_v1 = vcombine.low %v1574_v9, %v1588_v25  ;;  %v3402_v49 = vcombine.high %v1574_v9, %v1588_v25 }
 0x1d3   :  { %v1787_v58 = vcombine.low %v1779_v16, %v1786_v8  ;;  %v1915_v24 = vcombine.low %v1893_v2, %v1900_v21  ;;  %v1469_v61 = vrot.slane %v1453_v47, %v4223_v30  ;;  %v1868_v46 = vcombine.low %v1859_v32, %v1866_v55 }
 0x1d4   :  { %v1916_v13 = vcombine.low %v1907_v12, %v1914_v41  ;;  %v1941_v40 = vrot.slane %v1932_v1, %v4223_v30  ;;  %v1948_v44 = vrot.slane %v3402_v49, %v4223_v30  ;;  %v1462_v3 = vcombine.high %v1460_v43, %v1460_v43 }
 0x1d5   :  { %v2133_v39 = vsel %vm2132_vm7, %v1787_v58, -inf  ;;  %v1923_v50 = vrot.slane %v1915_v24, %v4223_v30  ;;  %v1476_v29 = vrot.slane %v1460_v43, %v4223_v30  ;;  %v1483_v33 = vrot.slane %v1461_v22, %v4223_v30 }
 0x1d6   :  { %v2134_v9 = vrot.slane %v2133_v39, 4  ;;  %v1930_v2 = vrot.slane %v1916_v13, %v4223_v30  ;;  %v1490_v4 = vrot.slane %v1462_v3, %v4223_v30  ;;  %v1491_v52 = vcombine.high %v1469_v61, %v1469_v61  ;;  %v4705_v13 = vld [vmem:[#allocation7 + $0xe0] sm:$0xff]  ;;  %v4710_v3 = vld [vmem:[#allocation7 + $0xf0] sm:$0xff] }
 0x1d7   :  { %v1788_v54 = vcombine.low %v1445_v34, %v1469_v61  ;;  %v532_v25 = vadd.f32 %v4574_v11, %v4639_v28  ;;  %v1963_v19 = vcombine.low %v1941_v40, %v1948_v44  ;;  %v1493_v20 = vcombine.high %v1483_v33, %v1483_v33 }
 0x1d8   :  { %v2135_v55 = vmax.f32 %v2133_v39, %v2134_v9  ;;  %v1931_v32 = vcombine.low %v1923_v50, %v1930_v2  ;;  %v1789_v17 = vcombine.low %v1483_v33, %v1491_v52  ;;  %v1818_v8 = vrot.slane %v1490_v4, %v4223_v30  ;;  %v4708_v50 = vld [vmem:[#allocation7 + $0xe8] sm:$0xff]  ;;  %v4722_v33 = vld [vmem:[%s4998_s4] ss:$0 sm:$0xff] }
 0x1d9   :  { %v1797_v16 = vrot.slane %v1788_v54, %v4223_v30  ;;  %v3400_v21 = vcombine.high %v1476_v29, %v1490_v4  ;;  %v1790_v41 = vcombine.low %v1493_v20, %v1476_v29  ;;  %v540_v1 = vmax.f32 %v532_v25, 0.0 }
 0x1da   :  { %v2136_v47 = vrot.slane %v2135_v55, 2  ;;  %v2154_v12 = vsel %vm2132_vm7, %v1931_v32, -inf  ;;  %v1804_v34 = vrot.slane %v1789_v17, %v4223_v30  ;;  %v560_v28 = vsel %vm559_vm8, %v4649_v35, %v4583_v26  ;;  %v4712_v26 = vld [vmem:[#allocation7 + $0xf8] sm:$0xff] }
 0x1db   :  { %v2155_v49 = vrot.slane %v2154_v12, 4  ;;  %v1845_v11 = vrot.slane %v3400_v21, %v4223_v30  ;;  %v1811_v24 = vrot.slane %v1790_v41, %v4223_v30  ;;  %v563_v43 = vsel %vm562_vm9, %v4659_v45, %v560_v28 }
 0x1dc   :  { %v2137_v58 = vmax.f32 %v2135_v55, %v2136_v47  ;;  %v564_v22 = vrot.slane %v539_v62, 2  ;;  %v1819_v44 = vcombine.low %v1797_v16, %v1804_v34  ;;  %v567_v39 = vrot.slane %v540_v1, 1 }
 0x1dd   :  { %v2156_v40 = vmax.f32 %v2154_v12, %v2155_v49  ;;  %v1867_v61 = vcombine.low %v1845_v11, %v4653_v14  ;;  %v1882_v35 = vrot.slane %v1868_v46, %v4223_v30  ;;  %v1820_v45 = vcombine.low %v1811_v24, %v1818_v8 }
 0x1de   :  { %v2138_v9 = vrot.slane %v2137_v58, 1  ;;  %v566_v42 = vsel %vm565_vm10, %v564_v22, %v563_v43  ;;  %v1827_v2 = vrot.slane %v1819_v44, %v4223_v30  ;;  %v3685_v46 = vpack.c.bf16 %v4708_v50, %v4705_v13 }
 0x1df   :  { %v2157_v62 = vrot.slane %v2156_v40, 2  ;;  %v1875_v29 = vrot.slane %v1867_v61, %v4223_v30  ;;  %v569_v14 = vsel %vm568_vm11, %v567_v39, %v566_v42  ;;  %v1834_v52 = vrot.slane %v1820_v45, %v4223_v30 }
 0x1e0   :  { %v2139_v4 = vmax.f32 %v2137_v58, %v2138_v9  ;;  %3546 = vmatmul.mubr.f32.vlgmr.msra.gmra.mrb[0].mxu1 %v569_v14  ;;  %v3688_v54 = vpack.c.bf16 %v4712_v26, %v4710_v3  ;;  %v4730_v25 = vrot.slane %v1963_v19, %v4223_v30 }
 0x1e1   :  { %v4732_v55 = vmax.f32 %v2156_v40, %v2157_v62  ;;  %v1883_v32 = vcombine.low %v1875_v29, %v1882_v35  ;;  %v3570_v20 = vpop.f32.mrb[12].mxu0  ;;  %3668 = vmatpush3.bf16.msra.mxu1 %v3667_v27  ;;  %3604 = vmatprep.mubr.msk.f32.mxu1 %vm3881_vm3, %v3882_v57  ;;  %v1835_v17 = vcombine.low %v1827_v2, %v1834_v52 }
 0x1e2   :  { %v1691_v16 = vcombine.high %v3570_v20, %v3570_v20  ;;  %v1698_v8 = vrot.slane %v3570_v20, %v4223_v30  ;;  %v1376_v21 = vpop.f32.mrb[13].mxu0  ;;  %3669 = vmatprep.subr.bf16.mxu1 %v3880_v56  ;;  %v4742_v19 = vadd.f32 %v4722_v33, %v2139_v4 }
 0x1e3   :  { %v2159_v47 = vrot.slane %v4732_v55, 1  ;;  %v2147_v12 = vsel %vm2132_vm7, %v1883_v32, -inf  ;;  %v1593_v41 = vcombine.high %v1376_v21, %v1376_v21  ;;  %v1600_v37 = vrot.slane %v1376_v21, %v4223_v30  ;;  %v3571_v38 = vpop.f32.mrb[14].mxu0 }
 0x1e4   :  { %v2140_v27 = vsel %vm2132_vm7, %v1835_v17, -inf  ;;  %v2148_v1 = vrot.slane %v2147_v12, 4  ;;  %v1705_v49 = vrot.slane %v1691_v16, %v4223_v30  ;;  %v1706_v34 = vcombine.high %v1698_v8, %v1698_v8  ;;  %v4749_v11 = vpop.f32.mrb[15].mxu0 }
 0x1e5   :  { %v2141_v28 = vrot.slane %v2140_v27, 4  ;;  %v4752_v58 = vrot.slane %v1698_v8, %v4223_v30  ;;  %v1607_v24 = vrot.slane %v1593_v41, %v4223_v30  ;;  %v1608_v43 = vcombine.high %v1600_v37, %v1600_v37  ;;  %3671 = vmatpush3.bf16.msra.mxu1 %v3670_v7 }
 0x1e6   :  { %v2149_v22 = vmax.f32 %v2147_v12, %v2148_v1  ;;  %v1707_v40 = vcombine.high %v1705_v49, %v1705_v49  ;;  %v1721_v44 = vrot.slane %v1705_v49, %v4223_v30  ;;  %v1728_v61 = vrot.slane %v1706_v34, %v4223_v30  ;;  %3672 = vmatprep.subr.bf16.mxu1 %v3880_v56 }
 0x1e7   :  { %v2142_v39 = vmax.f32 %v2140_v27, %v2141_v28  ;;  %v1736_v35 = vcombine.high %v4752_v58, %v4752_v58  ;;  %v2058_v9 = vrot.slane %v4752_v58, %v4223_v30  ;;  %v1609_v45 = vcombine.high %v1607_v24, %v1607_v24 }
 0x1e8   :  { %v2150_v42 = vrot.slane %v2149_v22, 2  ;;  %v1735_v31 = vrot.slane %v1707_v40, %v4223_v30  ;;  %v1737_v18 = vcombine.high %v1721_v44, %v1721_v44  ;;  %v1738_v7 = vcombine.high %v1728_v61, %v1728_v61 }
 0x1e9   :  { %v2143_v62 = vrot.slane %v2142_v39, 2  ;;  %v2076_v2 = vcombine.low %v1728_v61, %v1736_v35  ;;  %v1616_v29 = vrot.slane %v1600_v37, %v4223_v30  ;;  %v1623_v14 = vrot.slane %v1607_v24, %v4223_v30  ;;  %v2886_v4 = vpop.f32.mrb[16].mxu0  ;;  %3674 = vmatpush3.bf16.msra.mxu1 %v3673_v51 }
 0x1ea   :  { %v4771_v52 = vmax.f32 %v2149_v22, %v2150_v42  ;;  %v1739_v32 = vcombine.high %v1735_v31, %v1735_v31  ;;  %v2077_v20 = vcombine.low %v1738_v7, %v1721_v44  ;;  %v2078_v17 = vcombine.low %v1735_v31, %v1737_v18  ;;  %v2888_v16 = vpop.f32.mrb[17].mxu0  ;;  %3675 = vmatprep.subr.bf16.mxu1 %v3880_v56 }
 0x1eb   :  { %v2144_v8 = vmax.f32 %v2142_v39, %v2143_v62  ;;  %v2085_v21 = vrot.slane %v2076_v2, %v4223_v30  ;;  %v1630_v12 = vrot.slane %v1608_v43, %v4223_v30  ;;  %v1637_v41 = vrot.slane %v1609_v45, %v4223_v30  ;;  %v4777_v37 = vpop.f32.mrb[18].mxu0 }
 0x1ec   :  { %v2152_v59 = vrot.slane %v4771_v52, 1  ;;  %v2092_v5 = vrot.slane %v2077_v20, %v4223_v30  ;;  %v2099_v51 = vrot.slane %v2078_v17, %v4223_v30  ;;  %v2106_v38 = vrot.slane %v1739_v32, %v4223_v30  ;;  %v2891_v27 = vpop.f32.mrb[19].mxu0 }
 0x1ed   :  { %v2145_v1 = vrot.slane %v2144_v8, 1  ;;  %v1638_v49 = vcombine.high %v1616_v29, %v1616_v29  ;;  %v1639_v34 = vcombine.high %v1623_v14, %v1623_v14  ;;  %v1640_v28 = vcombine.high %v1630_v12, %v1630_v12  ;;  %3677 = vmatpush3.bf16.msra.mxu1 %v3676_v15 }
 0x1ee   :  { %v2107_v24 = vcombine.low %v2085_v21, %v2092_v5  ;;  %v2108_v43 = vcombine.low %v2099_v51, %v2106_v38  ;;  %v1934_v22 = vcombine.low %v1616_v29, %v1630_v12  ;;  %v1641_v40 = vcombine.high %v1637_v41, %v1637_v41  ;;  %3678 = vmatprep.subr.bf16.mxu1 %v3880_v56 }
 0x1ef   :  { %v4787_v44 = vmax.f32 %v2144_v8, %v2145_v1  ;;  %v1962_v61 = vrot.slane %v1638_v49, %v4223_v30  ;;  %v1980_v39 = vcombine.low %v1640_v28, %v1623_v14  ;;  %v1981_v35 = vcombine.low %v1637_v41, %v1639_v34 }
 0x1f0   :  { %v2115_v45 = vrot.slane %v2107_v24, %v4223_v30  ;;  %v2122_v42 = vrot.slane %v2108_v43, %v4223_v30  ;;  %v1955_v31 = vrot.slane %v1934_v22, %v4223_v30  ;;  %v1642_v10 = vcombine.high %v4749_v11, %v4749_v11 }
 0x1f1   :  { %v1989_v0 = vrot.slane %v1980_v39, %v4223_v30  ;;  %v1996_v15 = vrot.slane %v1981_v35, %v4223_v30  ;;  %v1649_v18 = vrot.slane %v4749_v11, %v4223_v30  ;;  %v2915_v7 = vcombine.high %v2886_v4, %v2886_v4  ;;  %v4799_v62 = vpop.f32.mrb[20].mxu0  ;;  %3680 = vmatpush3.bf16.msra.mxu1 %v3679_v48 }
 0x1f2   :  { %v4804_v2 = vcombine.low %v2115_v45, %v2122_v42  ;;  %v1964_v29 = vcombine.low %v1955_v31, %v1962_v61  ;;  %v1656_v14 = vrot.slane %v1642_v10, %v4223_v30  ;;  %v2922_v32 = vrot.slane %v2886_v4, %v4606_v63  ;;  %v2896_v20 = vpop.f32.mrb[21].mxu0  ;;  %3681 = vmatprep.subr.bf16.mxu1 %v3880_v56 }
 0x1f3   :  { %v2011_v17 = vcombine.low %v1989_v0, %v1996_v15  ;;  %v1657_v11 = vcombine.high %v1649_v18, %v1649_v18  ;;  %v1665_v16 = vrot.slane %v1649_v18, %v4223_v30  ;;  %v2929_v8 = vrot.slane %v2915_v7, %v4606_v63  ;;  %v4811_v21 = vpop.f32.mrb[22].mxu0 }
 0x1f4   :  { %v1978_v6 = vrot.slane %v1964_v29, %v4223_v30  ;;  %v1658_v53 = vcombine.high %v1656_v14, %v1656_v14  ;;  %v1672_v48 = vrot.slane %v1656_v14, %v4223_v30  ;;  %v2930_v12 = vcombine.high %v2922_v32, %v2922_v32  ;;  %v2899_v41 = vpop.f32.mrb[23].mxu0 }
 0x1f5   :  { %v2019_v4 = vrot.slane %v2011_v17, %v4223_v30  ;;  %v1679_v5 = vrot.slane %v1657_v11, %v4223_v30  ;;  %v1982_v51 = vcombine.low %v1641_v40, %v1665_v16  ;;  %v3031_v38 = vrot.slane %v2929_v8, %v4606_v63  ;;  %3683 = vmatpush3.bf16.msra.mxu1 %v3682_v60 }
 0x1f6   :  { %v1979_v27 = vcombine.low %v4730_v25, %v1978_v6  ;;  %v1686_v1 = vrot.slane %v1658_v53, %v4223_v30  ;;  %v3017_v49 = vcombine.low %v2922_v32, %v2930_v12  ;;  %v2931_v34 = vcombine.high %v2929_v8, %v2929_v8  ;;  %3684 = vmatprep.subr.bf16.mxu1 %v3880_v56 }
 0x1f7   :  { %v2003_v28 = vrot.slane %v1982_v51, %v4223_v30  ;;  %v2010_v24 = vrot.slane %v1679_v5, %v4223_v30  ;;  %v3403_v43 = vcombine.high %v1665_v16, %v1679_v5  ;;  %v2932_v22 = vcombine.high %v4777_v37, %v4777_v37 }
 0x1f8   :  { %v2161_v40 = vsel %vm2132_vm7, %v1979_v27, -inf  ;;  %v2029_v23 = vcombine.low %v1672_v48, %v1686_v1  ;;  %v3404_v36 = vcombine.high %v1672_v48, %v1686_v1  ;;  %v3024_v60 = vrot.slane %v3017_v49, %v4606_v63 }
 0x1f9   :  { %v2162_v25 = vrot.slane %v2161_v40, 4  ;;  %v2012_v61 = vcombine.low %v2003_v28, %v2010_v24  ;;  %v2037_v39 = vrot.slane %v3403_v43, %v4223_v30  ;;  %v2939_v35 = vrot.slane %v4777_v37, %v4606_v63  ;;  %v4833_v45 = vpop.f32.mrb[24].mxu0  ;;  %3686 = vmatpush3.bf16.msra.mxu1 %v3685_v46 }
 0x1fa   :  { %v2044_v42 = vrot.slane %v2029_v23, %v4223_v30  ;;  %v2051_v31 = vrot.slane %v3404_v36, %v4223_v30  ;;  %v3032_v10 = vcombine.low %v3024_v60, %v3031_v38  ;;  %v2946_v0 = vrot.slane %v2932_v22, %v4606_v63  ;;  %v2904_v15 = vpop.f32.mrb[25].mxu0  ;;  %3687 = vmatprep.subr.bf16.mxu1 %v3880_v56 }
 0x1fb   :  { %v2163_v18 = vmax.f32 %v2161_v40, %v2162_v25  ;;  %v2026_v7 = vrot.slane %v2012_v61, %v4223_v30  ;;  %v2947_v37 = vcombine.high %v2939_v35, %v2939_v35  ;;  %v3033_v29 = vcombine.low %v2931_v34, %v2939_v35  ;;  %v4843_v14 = vpop.f32.mrb[26].mxu0 }
 0x1fc   :  { %v2059_v32 = vcombine.low %v2037_v39, %v2044_v42  ;;  %v2060_v13 = vcombine.low %v2051_v31, %v2058_v9  ;;  %v3154_v50 = vsel %vm3153_vm12, %v3032_v10, -inf  ;;  %v2948_v46 = vcombine.high %v2946_v0, %v2946_v0  ;;  %v2907_v20 = vpop.f32.mrb[27].mxu0  ;;  %v4882_v42 = vld [vmem:[%s5000_s6] ss:$0 sm:$0xff] }
 0x1fd   :  { %v2164_v17 = vrot.slane %v2163_v18, 2  ;;  %v2027_v11 = vcombine.low %v2019_v4, %v2026_v7  ;;  %v3155_v16 = vrot.slane %v3154_v50, 4  ;;  %v3040_v8 = vrot.slane %v3033_v29, %v4606_v63  ;;  %3689 = vmatpush3.bf16.msra.mxu1 %v3688_v54 }
 0x1fe   :  { %v2067_v6 = vrot.slane %v2059_v32, %v4223_v30  ;;  %v2074_v53 = vrot.slane %v2060_v13, %v4223_v30  ;;  %v3047_v58 = vrot.slane %v2947_v37, %v4606_v63  ;;  %v3049_v9 = vcombine.low %v2946_v0, %v2948_v46  ;;  %3690 = vmatprep.subr.bf16.mxu1 %v3880_v56 }
 0x1ff   :  { %v4857_v48 = vmax.f32 %v2163_v18, %v2164_v17  ;;  %v2168_v12 = vsel %vm2132_vm7, %v2027_v11, -inf  ;;  %v3156_v41 = vmax.f32 %v3154_v50, %v3155_v16  ;;  %v2949_v4 = vcombine.high %v4799_v62, %v4799_v62 }
 0x200   :  { %v2075_v5 = vcombine.low %v2067_v6, %v2074_v53  ;;  %v2169_v3 = vrot.slane %v2168_v12, 4  ;;  %v3048_v26 = vcombine.low %v3040_v8, %v3047_v58  ;;  %v2956_v54 = vrot.slane %v4799_v62, %v4606_v63 }
 0x201   :  { %v3157_v30 = vrot.slane %v3156_v41, 2  ;;  %v2963_v51 = vrot.slane %v2949_v4, %v4606_v63  ;;  %v3056_v38 = vrot.slane %v3049_v9, %v4606_v63  ;;  %v2966_v27 = vcombine.high %v4811_v21, %v4811_v21 }
 0x202   :  { %v4868_v1 = vmax.f32 %v2168_v12, %v2169_v3  ;;  %v2175_v49 = vsel %vm2132_vm7, %v2075_v5, -inf  ;;  %v3161_v34 = vsel %vm3153_vm12, %v3048_v26, -inf  ;;  %v2964_v28 = vcombine.high %v2956_v54, %v2956_v54 }
 0x203   :  { %v2176_v24 = vrot.slane %v2175_v49, 4  ;;  %v3158_v43 = vmax.f32 %v3156_v41, %v3157_v30  ;;  %v3162_v22 = vrot.slane %v3161_v34, 4  ;;  %v2965_v40 = vcombine.high %v2963_v51, %v2963_v51 }
 0x204   :  { %v2171_v62 = vrot.slane %v4868_v1, 2  ;;  %v3063_v23 = vrot.slane %v2956_v54, %v4606_v63  ;;  %v3065_v36 = vcombine.low %v2964_v28, %v2963_v51  ;;  %v2973_v60 = vrot.slane %v4811_v21, %v4606_v63 }
 0x205   :  { %v4876_v25 = vmax.f32 %v2175_v49, %v2176_v24  ;;  %v3159_v61 = vrot.slane %v3158_v43, 1  ;;  %v3163_v39 = vmax.f32 %v3161_v34, %v3162_v22  ;;  %v3079_v35 = vrot.slane %v2965_v40, %v4606_v63 }
 0x206   :  { %v3064_v31 = vcombine.low %v3056_v38, %v3063_v23  ;;  %v3072_v10 = vrot.slane %v3065_v36, %v4606_v63  ;;  %v2980_v0 = vrot.slane %v2966_v27, %v4606_v63  ;;  %v2981_v15 = vcombine.high %v2973_v60, %v2973_v60 }
 0x207   :  { %v3160_v18 = vmax.f32 %v3158_v43, %v3159_v61  ;;  %v3164_v7 = vrot.slane %v3163_v39, 2  ;;  %v2983_v21 = vcombine.high %v4833_v45, %v4833_v45  ;;  %v2990_v37 = vrot.slane %v4833_v45, %v4606_v63 }
 0x208   :  { %v3080_v29 = vcombine.low %v3072_v10, %v3079_v35  ;;  %v3168_v32 = vsel %vm3153_vm12, %v3064_v31, -inf  ;;  %v3081_v13 = vcombine.low %v2973_v60, %v2981_v15  ;;  %v3095_v50 = vrot.slane %v2980_v0, %v4606_v63 }
 0x209   :  { %v4893_v46 = vadd.f32 %v4882_v42, %v3160_v18  ;;  %v3165_v20 = vmax.f32 %v3163_v39, %v3164_v7  ;;  %v3169_v17 = vrot.slane %v3168_v32, 4  ;;  %v2982_v11 = vcombine.high %v2980_v0, %v2980_v0 }
 0x20a   :  { %v3175_v16 = vsel %vm3153_vm12, %v3080_v29, -inf  ;;  %v3088_v8 = vrot.slane %v3081_v13, %v4606_v63  ;;  %v2997_v6 = vrot.slane %v2983_v21, %v4606_v63  ;;  %v2998_v53 = vcombine.high %v2990_v37, %v2990_v37 }
 0x20b   :  { %v3224_v45 = vmax.f32 %v4893_v46, 0.0  ;;  %v3166_v58 = vrot.slane %v3165_v20, 1  ;;  %v3170_v9 = vmax.f32 %v3168_v32, %v3169_v17  ;;  %v3176_v12 = vrot.slane %v3175_v16, 4 }
 0x20c   :  { %v3096_v41 = vcombine.low %v3088_v8, %v3095_v50  ;;  %v2999_v4 = vcombine.high %v2997_v6, %v2997_v6  ;;  %v3097_v5 = vcombine.low %v2982_v11, %v2990_v37  ;;  %v3111_v3 = vrot.slane %v2998_v53, %v4606_v63 }
 0x20d   :  { %v3167_v26 = vmax.f32 %v3165_v20, %v3166_v58  ;;  %v3171_v54 = vrot.slane %v3170_v9, 2  ;;  %v3177_v30 = vmax.f32 %v3175_v16, %v3176_v12  ;;  %v3000_v51 = vcombine.high %v4843_v14, %v4843_v14 }
 0x20e   :  { %v3182_v38 = vsel %vm3153_vm12, %v3096_v41, -inf  ;;  %v3104_v27 = vrot.slane %v3097_v5, %v4606_v63  ;;  %v3113_v49 = vcombine.low %v2997_v6, %v2999_v4  ;;  %v3007_v34 = vrot.slane %v4843_v14, %v4606_v63 }
 0x20f   :  { %v3217_v28 = vadd.f32 %v4882_v42, %v3167_v26  ;;  %v3172_v24 = vmax.f32 %v3170_v9, %v3171_v54  ;;  %v3178_v43 = vrot.slane %v3177_v30, 2  ;;  %v3183_v22 = vrot.slane %v3182_v38, 4 }
 0x210   :  { %v3112_v40 = vcombine.low %v3104_v27, %v3111_v3  ;;  %v3014_v23 = vrot.slane %v3000_v51, %v4606_v63  ;;  %v3015_v36 = vcombine.high %v3007_v34, %v3007_v34  ;;  %v3120_v60 = vrot.slane %v3113_v49, %v4606_v63 }
 0x211   :  { %v3225_v61 = vmax.f32 %v3217_v28, 0.0  ;;  %v3173_v39 = vrot.slane %v3172_v24, 1  ;;  %v3179_v35 = vmax.f32 %v3177_v30, %v3178_v43  ;;  %v3184_v31 = vmax.f32 %v3182_v38, %v3183_v22 }
 0x212   :  { %v3189_v10 = vsel %vm3153_vm12, %v3112_v40, -inf  ;;  %v3016_v0 = vcombine.high %v3014_v23, %v3014_v23  ;;  %v3127_v14 = vrot.slane %v3007_v34, %v4606_v63  ;;  %v3129_v15 = vcombine.low %v3015_v36, %v3014_v23 }
 0x213   :  { %v4911_v18 = vrot.slane %v3225_v61, 7  ;;  %v3174_v7 = vmax.f32 %v3172_v24, %v3173_v39  ;;  %v3180_v21 = vrot.slane %v3179_v35, 1  ;;  %v3185_v37 = vrot.slane %v3184_v31, 2 }
 0x214   :  { %v3190_v29 = vrot.slane %v3189_v10, 4  ;;  %v3128_v32 = vcombine.low %v3120_v60, %v3127_v14  ;;  %v3136_v13 = vrot.slane %v3129_v15, %v4606_v63  ;;  %v3143_v50 = vrot.slane %v3016_v0, %v4606_v63 }
 0x215   :  { %v4915_v20 = vmax.f32 %v3179_v35, %v3180_v21  ;;  %v3218_v17 = vadd.f32 %v4882_v42, %v3174_v7  ;;  %v3186_v11 = vmax.f32 %v3184_v31, %v3185_v37  ;;  %v2153_v16 = vmax.f32 %v4771_v52, %v2152_v59 }
 0x216   :  { %v3191_v8 = vmax.f32 %v3189_v10, %v3190_v29  ;;  %v3144_v6 = vcombine.low %v3136_v13, %v3143_v50  ;;  %v3196_v53 = vsel %vm3153_vm12, %v3128_v32, -inf  ;;  %v2160_v58 = vmax.f32 %v4732_v55, %v2159_v47 }
 0x217   :  { %v3226_v9 = vmax.f32 %v3218_v17, 0.0  ;;  %v3187_v12 = vrot.slane %v3186_v11, 1  ;;  %v3197_v63 = vrot.slane %v3196_v53, 4  ;;  %v2166_v41 = vrot.slane %v4857_v48, 1 }
 0x218   :  { %v3192_v4 = vrot.slane %v3191_v8, 2  ;;  %v3203_v5 = vsel %vm3153_vm12, %v3144_v6, -inf  ;;  %v2172_v52 = vmax.f32 %v4868_v1, %v2171_v62  ;;  %v2178_v59 = vrot.slane %v4876_v25, 2 }
 0x219   :  { %v4931_v3 = vrot.slane %v3226_v9, 6  ;;  %v3188_v26 = vmax.f32 %v3186_v11, %v3187_v12  ;;  %v3198_v54 = vmax.f32 %v3196_v53, %v3197_v63  ;;  %v3204_v30 = vrot.slane %v3203_v5, 4 }
 0x21a   :  { %v3193_v55 = vmax.f32 %v3191_v8, %v3192_v4  ;;  %v2167_v47 = vmax.f32 %v4857_v48, %v2166_v41  ;;  %v2173_v51 = vrot.slane %v2172_v52, 1  ;;  %v2179_v38 = vmax.f32 %v4876_v25, %v2178_v59 }
 0x21b   :  { %v3199_v27 = vrot.slane %v3198_v54, 2  ;;  %v3205_v49 = vmax.f32 %v3203_v5, %v3204_v30  ;;  %v2182_v34 = vsel %vm2132_vm7, %v4804_v2, -inf  ;;  %v2196_v1 = vadd.f32 %v4722_v33, %v4787_v44 }
 0x21c   :  { %v3194_v62 = vrot.slane %v3193_v55, 1  ;;  %v2174_v28 = vmax.f32 %v2172_v52, %v2173_v51  ;;  %v2180_v24 = vrot.slane %v2179_v38, 1  ;;  %v2183_v43 = vrot.slane %v2182_v34, 4 }
 0x21d   :  { %v3200_v22 = vmax.f32 %v3198_v54, %v3199_v27  ;;  %v3206_v40 = vrot.slane %v3205_v49, 2  ;;  %v2197_v23 = vadd.f32 %v4722_v33, %v2153_v16  ;;  %v2198_v48 = vadd.f32 %v4722_v33, %v2160_v58  ;;  %v123_v27 = vld [vmem:[#allocation7 + $0x100] sm:$0xff] }
 0x21e   :  { %v3195_v36 = vmax.f32 %v3193_v55, %v3194_v62  ;;  %v2181_v25 = vmax.f32 %v2179_v38, %v2180_v24  ;;  %v2184_v60 = vmax.f32 %v2182_v34, %v2183_v43  ;;  %v2199_v61 = vadd.f32 %v4722_v33, %v2167_v47 }
 0x21f   :  { %v3201_v39 = vrot.slane %v3200_v22, 1  ;;  %v2200_v2 = vadd.f32 %v4722_v33, %v2174_v28  ;;  %v2203_v44 = vmax.f32 %v4742_v19, 0.0  ;;  %v2204_v35 = vmax.f32 %v2196_v1, 0.0 }
 0x220   :  { %v2185_v31 = vrot.slane %v2184_v60, 2  ;;  %v2201_v10 = vadd.f32 %v4722_v33, %v2181_v25  ;;  %v2205_v0 = vmax.f32 %v2197_v23, 0.0  ;;  %v2206_v14 = vmax.f32 %v2198_v48, 0.0 }
 0x221   :  { %v3202_v15 = vmax.f32 %v3200_v22, %v3201_v39  ;;  %v2207_v7 = vmax.f32 %v2199_v61, 0.0  ;;  %v2208_v21 = vmax.f32 %v2200_v2, 0.0  ;;  %v2219_v37 = vrot.slane %v2204_v35, 7  ;;  %v127_v39 = vld [vmem:[#allocation7 + $0x120] sm:$0xff]  ;;  %v128_v2 = vld [vmem:[#allocation7 + $0x128] sm:$0xff]  ;;  %v129_v35 = vld [vmem:[#allocation7 + $0x130] sm:$0xff] }
 0x222   :  { %v2186_v29 = vmax.f32 %v2184_v60, %v2185_v31  ;;  %v2209_v32 = vmax.f32 %v2201_v10, 0.0  ;;  %v2221_v13 = vrot.slane %v2205_v0, 6  ;;  %v2223_v50 = vrot.slane %v2206_v14, 5  ;;  %v130_v31 = vld [vmem:[#allocation7 + $0x138] sm:$0xff]  ;;  %v131_v0 = vld [vmem:[#allocation7 + $0x140] sm:$0xff]  ;;  %v132_v14 = vld [vmem:[#allocation7 + $0x148] sm:$0xff] }
 0x223   :  { %v2220_v17 = vsel %vm550_vm4, %v2219_v37, %v2203_v44  ;;  %v2225_v11 = vrot.slane %v2207_v7, 4  ;;  %v2227_v16 = vrot.slane %v2208_v21, 3  ;;  %v3207_v8 = vmax.f32 %v3205_v49, %v3206_v40  ;;  %v124_v49 = vld [vmem:[#allocation7 + $0x108] sm:$0xff]  ;;  %v134_v7 = vld [vmem:[#allocation7 + $0x158] sm:$0xff]  ;;  %v135_v37 = vld [vmem:[#allocation7 + $0x160] sm:$0xff] }
 0x224   :  { %v2187_v19 = vrot.slane %v2186_v29, 1  ;;  %v2222_v6 = vsel %vm553_vm5, %v2221_v13, %v2220_v17  ;;  %v2229_v53 = vrot.slane %v2209_v32, 2  ;;  %v3219_v58 = vadd.f32 %v4882_v42, %v4915_v20  ;;  %v137_v13 = vld [vmem:[#allocation7 + $0x170] sm:$0xff] }
 0x225   :  { %v2224_v9 = vsel %vm556_vm6, %v2223_v50, %v2222_v6  ;;  %v3208_v12 = vrot.slane %v3207_v8, 1  ;;  %v3220_v63 = vadd.f32 %v4882_v42, %v3188_v26  ;;  %v3221_v41 = vadd.f32 %v4882_v42, %v3195_v36  ;;  %v138_v50 = vld [vmem:[#allocation7 + $0x178] sm:$0xff] }
 0x226   :  { %v2188_v4 = vmax.f32 %v2186_v29, %v2187_v19  ;;  %v2226_v5 = vsel %vm559_vm8, %v2225_v11, %v2224_v9  ;;  %v3222_v52 = vadd.f32 %v4882_v42, %v3202_v15  ;;  %v3227_v59 = vmax.f32 %v3219_v58, 0.0  ;;  %v136_v29 = vld [vmem:[#allocation7 + $0x168] sm:$0xff]  ;;  %v3343_v11 = vld [vmem:[%s5002_s8] ss:$0 sm:$0xff] }
 0x227   :  { %v2228_v54 = vsel %vm562_vm9, %v2227_v16, %v2226_v5  ;;  %v3209_v30 = vmax.f32 %v3207_v8, %v3208_v12  ;;  %v3228_v55 = vmax.f32 %v3220_v63, 0.0  ;;  %v3229_v47 = vmax.f32 %v3221_v41, 0.0 }
 0x228   :  { %v2202_v20 = vadd.f32 %v4722_v33, %v2188_v4  ;;  %v2230_v51 = vsel %vm565_vm10, %v2229_v53, %v2228_v54  ;;  %v3230_v38 = vmax.f32 %v3222_v52, 0.0  ;;  %v3241_v26 = vsel %vm550_vm4, %v4911_v18, %v3224_v45  ;;  %v125_v45 = vld [vmem:[#allocation7 + $0x110] sm:$0xff]  ;;  %v126_v18 = vld [vmem:[#allocation7 + $0x118] sm:$0xff] }
 0x229   :  { %v3223_v34 = vadd.f32 %v4882_v42, %v3209_v30  ;;  %v3243_v1 = vsel %vm553_vm5, %v4931_v3, %v3241_v26  ;;  %v3244_v62 = vrot.slane %v3227_v59, 5  ;;  %v3246_v28 = vrot.slane %v3228_v55, 4 }
 0x22a   :  { %v2210_v24 = vmax.f32 %v2202_v20, 0.0  ;;  %v3248_v43 = vrot.slane %v3229_v47, 3  ;;  %v3250_v33 = vrot.slane %v3230_v38, 2  ;;  %v3691_v46 = vpack.c.bf16 %v124_v49, %v123_v27 }
 0x22b   :  { %v3231_v22 = vmax.f32 %v3223_v34, 0.0  ;;  %v3245_v40 = vsel %vm556_vm6, %v3244_v62, %v3243_v1  ;;  %v3694_v61 = vpack.c.bf16 %v126_v18, %v125_v45  ;;  %v3697_v44 = vpack.c.bf16 %v128_v2, %v127_v39 }
 0x22c   :  { %v2231_v23 = vrot.slane %v2210_v24, 1  ;;  %v3247_v48 = vsel %vm559_vm8, %v3246_v28, %v3245_v40  ;;  %v3700_v10 = vpack.c.bf16 %v130_v31, %v129_v35  ;;  %v3703_v15 = vpack.c.bf16 %v132_v14, %v131_v0 }
 0x22d   :  { %v3249_v36 = vsel %vm562_vm9, %v3248_v43, %v3247_v48  ;;  %v3252_v42 = vrot.slane %v3231_v22, 1  ;;  %v3709_v32 = vpack.c.bf16 %v136_v29, %v135_v37  ;;  %v3712_v17 = vpack.c.bf16 %v138_v50, %v137_v13 }
 0x22e   :  { %v2232_v25 = vsel %vm568_vm11, %v2231_v23, %v2230_v51  ;;  %v3251_v3 = vsel %vm565_vm10, %v3250_v33, %v3249_v36 }
 0x22f   :  { %3605 = vmatmul.mubr.f32.vlgmr.msra.gmra.mrb[0].mxu1 %v2232_v25  ;;  %v3253_v60 = vsel %vm568_vm11, %v3252_v42, %v3251_v3 }
 0x230   :  { %3692 = vmatpush3.bf16.msra.mxu1 %v3691_v46  ;;  %3639 = vmatprep.mubr.msk.f32.mxu1 %vm3881_vm3, %v3882_v57  ;;  %v133_v57 = vld [vmem:[#allocation7 + $0x150] sm:$0xff] }
 0x231   :  { %3693 = vmatprep.subr.bf16.mxu1 %v3880_v56  ;;  %v3706_v21 = vpack.c.bf16 %v134_v7, %v133_v57 }
 0x234   :  { %3695 = vmatpush3.bf16.msra.mxu1 %v3694_v61 }
 0x235   :  { %3696 = vmatprep.subr.bf16.mxu1 %v3880_v56 }
 0x238   :  { %3698 = vmatpush3.bf16.msra.mxu1 %v3697_v44 }
 0x239   :  { %3699 = vmatprep.subr.bf16.mxu1 %v3880_v56 }
 0x23c   :  { %3701 = vmatpush3.bf16.msra.mxu1 %v3700_v10 }
 0x23d   :  { %3702 = vmatprep.subr.bf16.mxu1 %v3880_v56 }
 0x240   :  { %3704 = vmatpush3.bf16.msra.mxu1 %v3703_v15 }
 0x241   :  { %3705 = vmatprep.subr.bf16.mxu1 %v3880_v56 }
 0x244   :  { %3707 = vmatpush3.bf16.msra.mxu1 %v3706_v21 }
 0x245   :  { %3708 = vmatprep.subr.bf16.mxu1 %v3880_v56 }
 0x248   :  { %3710 = vmatpush3.bf16.msra.mxu1 %v3709_v32 }
 0x249   :  { %3711 = vmatprep.subr.bf16.mxu1 %v3880_v56 }
 0x24c   :  { %3713 = vmatpush3.bf16.msra.mxu1 %v3712_v17 }
 0x24f   :  { %3640 = vmatmul.mubr.f32.vlgmr.msra.gmra.mrb[0].mxu1 %v3253_v60 }
 0x322   :  { %v3321_v16 = vpop.f32.mrb[0].mxu1 }
 0x323   :  { %v3714_v8 = vadd.f32 %v3343_v11, %v3321_v16  ;;  %v3641_v19 = vpop.f32.mrb[1].mxu1 }
 0x325   :  { %3326 = vst [vmem:[#allocation8] sm:$0xff] %v3714_v8 }
 0x326   :  { %3852 = shalt.err (!%p3849_p0)
}
 0x327   :  { %s3853_s18 = scalar_lea.hbm %s5003_s9, 128 }
 0x328   :  { %p3854_p1 = scmp.ne.s32.totalorder %s5003_s9, %s3853_s18  ;;  %p3857_p2 = scmp.lt.u32.totalorder %s3853_s18, %s5003_s9 }
 0x32a   :  { %p3859_p3 = pnand %p3857_p2, %p3854_p1 }
 0x32c   :  { %3862 = shalt.err (!%p3859_p3)
}
 0x32d   :  { %3336 = dma.vmem_to_hbm [thread:$0]  %s3334_s0, 128, %s5003_s9, [#allocation4]  }
 0x32e   :  { %3867 = dma.done.wait [#allocation4], 128  }
 0x32f   :  { %3868 = vsyncadd [#allocation4], 4294967168 }
 0x330   :  { %3340 = vsyncpa [#allocation3], 1 }
 0x331   :  { %3341 = vsyncpa [#allocation6], 1 }
 0x332   :  { %3342 = vsyncpa [#allocation4], 1 }

</bundles_post_ra>
